<compile_context>
chip_gen: v6e
topology: v6e:2x2x1
jax: 0.10.0
libtpu: 0.0.40
codegen_flags: <defaults>
</compile_context>

<pallas_src>
import jax
import jax.numpy as jnp
from jax.experimental import pallas as pl
from jax.experimental.pallas import tpu as pltpu


# ---------------------------------------------------------------------------
# Kernel
# ---------------------------------------------------------------------------
def ffn_kernel(x_ref, w1_ref, b1_ref, w2_ref, b2_ref, o_ref, acc_ref):
    # x_ref:  (tile_m, D)       bf16 input rows        (resident across j, k)
    # w1_ref: (D, tile_h)       bf16 W1 chunk
    # b1_ref: (1, tile_h)       f32 bias1 chunk
    # w2_ref: (tile_h, tile_d)  bf16 W2 chunk
    # b2_ref: (1, tile_d)       f32 bias2 chunk
    # o_ref:  (tile_m, tile_d)  output                 (resident across k)
    # acc_ref:(tile_m, tile_d)  f32 accumulator scratch
    k = pl.program_id(2)

    @pl.when(k == 0)
    def _():
        acc_ref[...] = jnp.zeros_like(acc_ref)

    # First matmul on the MXU: bf16 x bf16 -> f32 accumulation.
    h = jnp.dot(x_ref[...], w1_ref[...], preferred_element_type=jnp.float32)
    # Bias + ReLU in f32 on the VPU (v5e has no bf16 VALU).
    h = jnp.maximum(h + b1_ref[...], 0.0)
    # Second matmul: cast to bf16 only at the MXU boundary, accumulate in f32.
    acc_ref[...] += jnp.dot(h.astype(jnp.bfloat16), w2_ref[...],
                            preferred_element_type=jnp.float32)

    @pl.when(k == pl.num_programs(2) - 1)
    def _():
        o_ref[...] = (acc_ref[...] + b2_ref[...]).astype(o_ref.dtype)


# ---------------------------------------------------------------------------
# Tiling helpers
# ---------------------------------------------------------------------------
def _round_up(x, m):
    return ((x + m - 1) // m) * m


def _tpu_vmem_capacity():
    """Physical VMEM bytes for this generation (fallback: v7x's 64 MiB)."""
    try:
        cap = int(pltpu.get_tpu_info().vmem_capacity_bytes)
        if cap > 0:
            return cap
    except Exception:
        pass
    return 64 * 1024 * 1024


def _choose_tile_h(H, min_tile=512, max_tile=1024):
    """Pick a hidden-dim tile in [512, 1024] (multiple of 128) minimizing padding."""
    h128 = _round_up(H, 128)
    if h128 <= max_tile:
        return h128
    best_th, best_key = None, None
    for th in range(min_tile, max_tile + 1, 128):
        pad = _round_up(H, th) - H
        key = (pad, -th)                      # least padding, then largest tile
        if best_key is None or key < best_key:
            best_key, best_th = key, th
    return best_th


def _tile_h_from_padded(H_pad, max_tile=1024):
    """Largest multiple-of-128 divisor of H_pad that is <= max_tile."""
    th = (min(H_pad, max_tile) // 128) * 128
    while H_pad % th:
        th -= 128
    return th


def _vmem_estimate(tile_m, tile_h, tile_d, D, out_itemsize):
    return (2 * tile_m * D * 2            # x block (bf16), double-buffered
            + 2 * D * tile_h * 2          # W1 chunk (bf16)
            + 2 * tile_h * 4              # b1 chunk (f32)
            + 2 * tile_h * tile_d * 2     # W2 chunk (bf16)
            + 2 * tile_d * 4              # b2 chunk (f32)
            + 2 * tile_m * tile_d * out_itemsize   # out block
            + tile_m * tile_d * 4         # f32 accumulator scratch
            + tile_m * tile_h * 4)        # f32 hidden-activation temporary


# ---------------------------------------------------------------------------
# Wrapper
# ---------------------------------------------------------------------------
def prepare_params(w1, b1, w2, b2):
    """One-time prep (hoisted out of the hot path): cast weights to bf16 and
    pad the hidden dim to a multiple of the chosen tile_h with zeros."""
    D, H = w1.shape
    tile_h = _choose_tile_h(H)
    H_pad = _round_up(H, tile_h)
    pad_h = H_pad - H
    w1p = jnp.pad(w1.astype(jnp.bfloat16), ((0, 0), (0, pad_h)))
    b1p = jnp.pad(b1.astype(jnp.float32), (0, pad_h)).reshape(1, H_pad)
    w2p = jnp.pad(w2.astype(jnp.bfloat16), ((0, pad_h), (0, 0)))
    b2p = b2.astype(jnp.float32).reshape(1, D)
    return w1p, b1p, w2p, b2p


def feed_forward(x, w1p, b1p, w2p, b2p, out_dtype=jnp.bfloat16):
    """x: (..., D). Prepared params from prepare_params(). Returns (..., D)."""
    lead = x.shape[:-1]
    D = x.shape[-1]
    M = 1
    for s in lead:
        M *= s
    H_pad = w1p.shape[1]
    tile_h = _tile_h_from_padded(H_pad)
    out_itemsize = jnp.dtype(out_dtype).itemsize

    # --- Generation-aware tile_m / VMEM budget ---------------------------------
    cap = _tpu_vmem_capacity()
    budget = int(0.60 * cap)                       # headroom for compiler scratch
    target_m = 1024 if cap >= 96 * 1024 * 1024 else 512   # v5e/v6e vs v7x
    tile_m = min(target_m, _round_up(M, 128))
    while tile_m > 128 and 1.25 * _vmem_estimate(tile_m, tile_h, D, D,
                                                 out_itemsize) > budget:
        tile_m -= 128
    tile_m = max(tile_m, 128)

    M_pad = _round_up(M, tile_m)
    m_tiles = M_pad // tile_m

    # --- Split the output D dim when only one row tile (keep both TCs busy) ----
    tile_d = D
    if m_tiles == 1 and D >= 256 and D % 128 == 0:
        for td in range(((D // 2) // 128) * 128, 127, -128):
            if D % td == 0:
                tile_d = td
                break
    d_tiles = D // tile_d
    k_tiles = H_pad // tile_h

    # --- Input prep (only what must happen per call) ---------------------------
    x2 = x.reshape(M, D)
    if x2.dtype != jnp.bfloat16:
        x2 = x2.astype(jnp.bfloat16)
    if M_pad != M:
        x2 = jnp.pad(x2, ((0, M_pad - M), (0, 0)))

    est = _vmem_estimate(tile_m, tile_h, tile_d, D, out_itemsize)
    vmem_limit = int(min(max(2 * est, 32 * 1024 * 1024), int(0.80 * cap)))

    grid = (m_tiles, d_tiles, k_tiles)

    out2 = pl.pallas_call(
        ffn_kernel,
        out_shape=jax.ShapeDtypeStruct((M_pad, D), out_dtype),
        grid_spec=pltpu.PrefetchScalarGridSpec(
            num_scalar_prefetch=0,
            grid=grid,
            in_specs=[
                pl.BlockSpec((tile_m, D), lambda i, j, k: (i, 0)),       # x rows
                pl.BlockSpec((D, tile_h), lambda i, j, k: (0, k)),       # W1 chunk
                pl.BlockSpec((1, tile_h), lambda i, j, k: (0, k)),       # b1 chunk
                pl.BlockSpec((tile_h, tile_d), lambda i, j, k: (k, j)),  # W2 chunk
                pl.BlockSpec((1, tile_d), lambda i, j, k: (0, j)),       # b2 chunk
            ],
            out_specs=pl.BlockSpec((tile_m, tile_d), lambda i, j, k: (i, j)),
            scratch_shapes=[pltpu.VMEM((tile_m, tile_d), jnp.float32)],
        ),
        compiler_params=pltpu.CompilerParams(
            dimension_semantics=("parallel", "parallel", "arbitrary"),
            vmem_limit_bytes=vmem_limit,
        ),
    )(x2, w1p, b1p, w2p, b2p)

    if M_pad != M:
        out2 = out2[:M]
    return out2.reshape(*lead, D)


# ---------------------------------------------------------------------------
# Param init matching nn.Linear's U(-1/sqrt(fan_in), 1/sqrt(fan_in))
# ---------------------------------------------------------------------------
def make_params(key, n_embed):
    hidden = 4 * n_embed
    k1, k2, k3, k4 = jax.random.split(key, 4)
    bound1 = 1.0 / jnp.sqrt(n_embed)
    bound2 = 1.0 / jnp.sqrt(hidden)
    w1 = jax.random.uniform(k1, (n_embed, hidden), jnp.float32, -bound1, bound1)
    b1 = jax.random.uniform(k2, (hidden,), jnp.float32, -bound1, bound1)
    w2 = jax.random.uniform(k3, (hidden, n_embed), jnp.float32, -bound2, bound2)
    b2 = jax.random.uniform(k4, (n_embed,), jnp.float32, -bound2, bound2)
    return w1, b1, w2, b2


if __name__ == "__main__":
    # Shapes consistent with the module: n_embed = 384, small batch/seq.
    B, T, n_embed = 2, 8, 384
    key = jax.random.PRNGKey(0)
    kx, kp = jax.random.split(key)
    x = jax.random.normal(kx, (B, T, n_embed), jnp.float32)
    w1, b1, w2, b2 = make_params(kp, n_embed)

    # One-time weight prep (bf16 cast + hidden-dim padding) -- hot path only casts x.
    w1p, b1p, w2p, b2p = prepare_params(w1, b1, w2, b2)

    ffn = jax.jit(feed_forward)
    out = ffn(x, w1p, b1p, w2p, b2p)
    out = jax.block_until_ready(out)
    assert out.shape == (B, T, n_embed)
    out_f32 = out.astype(jnp.float32)

    # Reference mimicking the kernel's bf16 MXU inputs / f32 accumulation.
    M, D, H = B * T, n_embed, 4 * n_embed
    xb = x.reshape(M, D).astype(jnp.bfloat16).astype(jnp.float32)
    w1b = w1.astype(jnp.bfloat16).astype(jnp.float32)
    w2b = w2.astype(jnp.bfloat16).astype(jnp.float32)
    h_ref = jnp.maximum(xb @ w1b + b1, 0.0)
    ref = (h_ref.astype(jnp.bfloat16).astype(jnp.float32) @ w2b + b2).reshape(B, T, D)
    assert jnp.allclose(out_f32, ref, atol=2e-2, rtol=2e-2), "mismatch vs bf16 reference"

    # Loose sanity check against the pure f32 PyTorch-equivalent math.
    ref_f32 = jnp.maximum(x @ w1 + b1, 0.0) @ w2 + b2
    assert jnp.allclose(out_f32, ref_f32, atol=1e-1, rtol=1e-1), "mismatch vs f32 reference"

    print("KERNEL_OK")
</pallas_src>

<mosaic_0001>
module attributes {stable_mosaic.version = 11 : i64} {
  func.func @ffn_kernel(%arg0: i32, %arg1: i32, %arg2: i32, %arg3: memref<128x384xbf16, #tpu.memory_space<vmem>>, %arg4: memref<384x768xbf16, #tpu.memory_space<vmem>>, %arg5: memref<1x768xf32, #tpu.memory_space<vmem>>, %arg6: memref<768x128xbf16, #tpu.memory_space<vmem>>, %arg7: memref<1x128xf32, #tpu.memory_space<vmem>>, %arg8: memref<128x128xbf16, #tpu.memory_space<vmem>>, %arg9: memref<128x128xf32, #tpu.memory_space<vmem>>) attributes {dimension_semantics = [#tpu.dimension_semantics<parallel>, #tpu.dimension_semantics<parallel>, #tpu.dimension_semantics<arbitrary>], iteration_bounds = array<i64: 1, 3, 2>, scalar_prefetch = 0 : i64, scratch_operands = 1 : i64, tpu.core_type = #tpu.core_type<tc>, window_params = [{transform_indices = @transform_0, window_bounds = array<i64: 128, 384>}, {transform_indices = @transform_1, window_bounds = array<i64: 384, 768>}, {transform_indices = @transform_2, window_bounds = array<i64: 1, 768>}, {transform_indices = @transform_3, window_bounds = array<i64: 768, 128>}, {transform_indices = @transform_4, window_bounds = array<i64: 1, 128>}, {transform_indices = @transform_5, window_bounds = array<i64: 128, 128>}]} {
    %c0_i32 = arith.constant 0 : i32
    %0 = arith.cmpi eq, %arg2, %c0_i32 : i32
    %1 = arith.extui %0 : i1 to i32
    %c0_i32_0 = arith.constant 0 : i32
    %2 = arith.cmpi ne, %1, %c0_i32_0 : i32
    scf.if %2 {
      %cst_15 = arith.constant 0.000000e+00 : f32
      %20 = vector.broadcast %cst_15 : f32 to vector<128x128xf32>
      %c0_16 = arith.constant 0 : index
      %c0_17 = arith.constant 0 : index
      %21 = vector.load %arg9[%c0_16, %c0_17] : memref<128x128xf32, #tpu.memory_space<vmem>>, vector<128x128xf32>
      tpu.vector_store %arg9[%c0_16, %c0_17], %20 {strides = array<i32>} : memref<128x128xf32, #tpu.memory_space<vmem>>, vector<128x128xf32>,
    } else {
    }
    %c0 = arith.constant 0 : index
    %c0_1 = arith.constant 0 : index
    %3 = vector.load %arg3[%c0, %c0_1] : memref<128x384xbf16, #tpu.memory_space<vmem>>, vector<128x384xbf16>
    %c0_2 = arith.constant 0 : index
    %c0_3 = arith.constant 0 : index
    %4 = vector.load %arg4[%c0_2, %c0_3] : memref<384x768xbf16, #tpu.memory_space<vmem>>, vector<384x768xbf16>
    %cst = arith.constant dense<0.000000e+00> : vector<128x768xf32>
    %5 = tpu.matmul %3, %4, %cst {dimension_numbers = #tpu.dot_dimension_numbers<[1], [0], [0], [1], [0, 0, 1, 1], [], []>} : vector<128x384xbf16>, vector<384x768xbf16>, vector<128x768xf32> -> vector<128x768xf32>
    %c0_4 = arith.constant 0 : index
    %c0_5 = arith.constant 0 : index
    %6 = vector.load %arg5[%c0_4, %c0_5] : memref<1x768xf32, #tpu.memory_space<vmem>>, vector<1x768xf32>
    %7 = vector.broadcast %6 : vector<1x768xf32> to vector<128x768xf32>
    %8 = arith.addf %5, %7 : vector<128x768xf32>
    %cst_6 = arith.constant 0.000000e+00 : f32
    %9 = vector.broadcast %cst_6 : f32 to vector<128x768xf32>
    %10 = arith.maximumf %8, %9 : vector<128x768xf32>
    %c0_7 = arith.constant 0 : index
    %c0_8 = arith.constant 0 : index
    %11 = vector.load %arg9[%c0_7, %c0_8] : memref<128x128xf32, #tpu.memory_space<vmem>>, vector<128x128xf32>
    %12 = arith.truncf %10 : vector<128x768xf32> to vector<128x768xbf16>
    %c0_9 = arith.constant 0 : index
    %c0_10 = arith.constant 0 : index
    %13 = vector.load %arg6[%c0_9, %c0_10] : memref<768x128xbf16, #tpu.memory_space<vmem>>, vector<768x128xbf16>
    %cst_11 = arith.constant dense<0.000000e+00> : vector<128x128xf32>
    %14 = tpu.matmul %12, %13, %cst_11 {dimension_numbers = #tpu.dot_dimension_numbers<[1], [0], [0], [1], [0, 0, 1, 1], [], []>} : vector<128x768xbf16>, vector<768x128xbf16>, vector<128x128xf32> -> vector<128x128xf32>
    %15 = arith.addf %11, %14 : vector<128x128xf32>
    %c0_12 = arith.constant 0 : index
    %c0_13 = arith.constant 0 : index
    %16 = vector.load %arg9[%c0_12, %c0_13] : memref<128x128xf32, #tpu.memory_space<vmem>>, vector<128x128xf32>
    tpu.vector_store %arg9[%c0_12, %c0_13], %15 {strides = array<i32>} : memref<128x128xf32, #tpu.memory_space<vmem>>, vector<128x128xf32>,
    %c1_i32 = arith.constant 1 : i32
    %17 = arith.cmpi eq, %arg2, %c1_i32 : i32
    %18 = arith.extui %17 : i1 to i32
    %c0_i32_14 = arith.constant 0 : i32
    %19 = arith.cmpi ne, %18, %c0_i32_14 : i32
    scf.if %19 {
      %c0_15 = arith.constant 0 : index
      %c0_16 = arith.constant 0 : index
      %20 = vector.load %arg9[%c0_15, %c0_16] : memref<128x128xf32, #tpu.memory_space<vmem>>, vector<128x128xf32>
      %c0_17 = arith.constant 0 : index
      %c0_18 = arith.constant 0 : index
      %21 = vector.load %arg7[%c0_17, %c0_18] : memref<1x128xf32, #tpu.memory_space<vmem>>, vector<1x128xf32>
      %22 = vector.broadcast %21 : vector<1x128xf32> to vector<128x128xf32>
      %23 = arith.addf %20, %22 : vector<128x128xf32>
      %24 = arith.truncf %23 : vector<128x128xf32> to vector<128x128xbf16>
      %c0_19 = arith.constant 0 : index
      %c0_20 = arith.constant 0 : index
      %25 = vector.load %arg8[%c0_19, %c0_20] : memref<128x128xbf16, #tpu.memory_space<vmem>>, vector<128x128xbf16>
      tpu.vector_store %arg8[%c0_19, %c0_20], %24 {strides = array<i32>} : memref<128x128xbf16, #tpu.memory_space<vmem>>, vector<128x128xbf16>,
    } else {
    }
    return
  }
  func.func @transform_0(%arg0: i32, %arg1: i32, %arg2: i32) -> (i32, i32) {
    %c0_i32 = arith.constant 0 : i32
    %c0_i32_0 = arith.constant 0 : i32
    return %arg0, %c0_i32 : i32, i32
  }
  func.func @transform_1(%arg0: i32, %arg1: i32, %arg2: i32) -> (i32, i32) {
    %c0_i32 = arith.constant 0 : i32
    %c0_i32_0 = arith.constant 0 : i32
    return %c0_i32, %arg2 : i32, i32
  }
  func.func @transform_2(%arg0: i32, %arg1: i32, %arg2: i32) -> (i32, i32) {
    %c0_i32 = arith.constant 0 : i32
    %c0_i32_0 = arith.constant 0 : i32
    return %c0_i32, %arg2 : i32, i32
  }
  func.func @transform_3(%arg0: i32, %arg1: i32, %arg2: i32) -> (i32, i32) {
    %c0_i32 = arith.constant 0 : i32
    return %arg2, %arg1 : i32, i32
  }
  func.func @transform_4(%arg0: i32, %arg1: i32, %arg2: i32) -> (i32, i32) {
    %c0_i32 = arith.constant 0 : i32
    %c0_i32_0 = arith.constant 0 : i32
    return %c0_i32, %arg1 : i32, i32
  }
  func.func @transform_5(%arg0: i32, %arg1: i32, %arg2: i32) -> (i32, i32) {
    %c0_i32 = arith.constant 0 : i32
    return %arg0, %arg1 : i32, i32
  }
}

</mosaic_0001>

<bundles_post_ra>
// kernel: feed_forward.1
= control target key start
LH: loop header
LB: loop body
LE: loop exit
PB: predicated region body
PF: predicated region fallthrough
CT: control target
= control target key end

     0   :  { %s6007_s0 = inlined_call_operand.vmem [shape: bf16[128,384], index: 0, kind: input, shape index: {}]   ;;  %s6008_s1 = inlined_call_operand.hbm [shape: bf16[384,1536], index: 1, kind: input, shape index: {}]   ;;  %s6009_s2 = inlined_call_operand.hbm [shape: f32[1,1536], index: 2, kind: input, shape index: {}]   ;;  %s6010_s3 = inlined_call_operand.hbm [shape: bf16[1536,384], index: 3, kind: input, shape index: {}]   ;;  %s6011_s4 = inlined_call_operand.hbm [shape: f32[1,384], index: 4, kind: input, shape index: {}]   ;;  %s6012_s5 = inlined_call_operand.vmem [shape: bf16[128,384], index: 5, kind: output, shape index: {}]  }
   0x1   :  { %6028 = sst [smem:[#allocation40_spill]] %s6007_s0 }
   0x2   :  { %6029 = sst [smem:[#allocation41_spill]] %s6008_s1 }
   0x3   :  { %6030 = sst [smem:[#allocation42_spill]] %s6009_s2 }
   0x4   :  { %6031 = sst [smem:[#allocation43_spill]] %s6012_s5 }
   0x5   :  { %10 = vsyncpa [#allocation4], 0 }
   0x6   :  { %12 = vsyncpa [#allocation4 + $0x1], 0 }
   0x7   :  { %13 = vsyncpa [#allocation6], 0 }
   0x8   :  { %15 = vsyncpa [#allocation6 + $0x1], 0 }
   0x9   :  { %16 = vsyncpa [#allocation9], 0 }
   0xa   :  { %18 = vsyncpa [#allocation9 + $0x1], 0  ;;  %s4673_s18 = smov 0   ;;  %s4675_s19 = smov 0  }
   0xb   :  { %s4677_s20 = smov 0   ;;  %s4679_s21 = smov 0  }
   0xc   :  { %s4681_s22 = smov 0   ;;  %s4683_s23 = smov 0  }
   0xd   :  { %s4685_s24 = smov 0   ;;  %s4687_s25 = smov 0  }
   0xe   :  { %s4689_s26 = smov 0   ;;  %s4691_s27 = smov 0  }
   0xf   :  { %s4693_s28 = smov 0   ;;  %s4695_s29 = smov 0  }
  0x10   :  { %s4697_s30 = smov 0   ;;  %s4699_s6 = smov 0  }
  0x11 LB: > { %6032 = sst [smem:[#allocation15_spill]] %s4593_s22  ;;  %s4742_s7 = sadd.s32 4294967295, %s4629_s6   ;;  %s4629_s6 = sphi %s4699_s6, %s24_s6   ;;  %s4625_s30 = sphi %s4697_s30, %s6113_s30   ;;  %s4621_s29 = sphi %s4695_s29, %s6112_s29   ;;  %s4617_s28 = sphi %s4693_s28, %s6111_s28   ;;  %s4613_s27 = sphi %s4691_s27, %s6110_s27   ;;  %s4609_s26 = sphi %s4689_s26, %s6109_s26   ;;  %s4605_s25 = sphi %s4687_s25, %s6101_s25   ;;  %s4601_s24 = sphi %s4685_s24, %s6100_s24   ;;  %s4597_s23 = sphi %s4683_s23, %s6099_s23   ;;  %s4593_s22 = sphi %s4681_s22, %s6098_s22   ;;  %s4589_s21 = sphi %s4679_s21, %s6097_s21   ;;  %s4585_s20 = sphi %s4677_s20, %s6108_s20   ;;  %s4581_s19 = sphi %s4675_s19, %s6107_s19   ;;  %s4577_s18 = sphi %s4673_s18, %s6106_s18  }
  0x12   : > { %6033 = sst [smem:[#allocation16_spill]] %s4597_s23  ;;  %s36_s8 = sadd.s32 1, %s4621_s29 }
  0x13   : > { %6034 = sst [smem:[#allocation17_spill]] %s4605_s25  ;;  %p37_p0 = scmp.ge.s32.totalorder %s36_s8, 2 }
  0x14   : > { %6035 = sst [smem:[#allocation18_spill]] %s4609_s26  ;;  %s39_s9 = sadd.s32 1, %s4625_s30 }
  0x15   : > { %6036 = sst [smem:[#allocation19_spill]] %s4613_s27  ;;  %s76_s10 = sadd.s32 1, %s4609_s26 }
  0x16   : > { %6037 = sst [smem:[#allocation20_spill]] %s4617_s28  ;;  %p83_p1 = scmp.ne.s32.totalorder %s4609_s26, %s4605_s25 }
  0x17   : > { %s6115_s8 = smov (%p37_p0, %s36_s8), 0  ;;  %s6117_s9 = smov (!%p37_p0, %s39_s9), %s4625_s30 }
  0x18   : > { %6038 = sst [smem:[#allocation21_spill]] %s6115_s8  ;;  %s73_s11 = ssub.s32 %s4621_s29, %s6115_s8 }
  0x19   : > { %p84_p2 = scmp.eq.s32.totalorder %s4629_s6, 0  ;;  %p41_p3 = scmp.ge.s32.totalorder %s6117_s9, 3 }
  0x1a   : > { %p74_p4 = scmp.eq.s32.totalorder %s73_s11, 0  ;;  %p89_p6 = scmp.ne.s32.totalorder %s4605_s25, %s4601_s24 }
  0x1b   : > { %p4757_p5 = por %p84_p2, %p83_p1  ;;  %s6119_s9 = smov (%p41_p3, %s6117_s9), 0 }
  0x1c   : > { %6040 = sst [smem:[#allocation22_spill]] %s6119_s9  ;;  %p6023_p7 = scmp.eq.s32.totalorder %s4742_s7, 0 }
  0x1d   : > { %s4765_s13 = scalar_select %p74_p4, %s4609_s26, %s76_s10  }
  0x1e   : > { %s4770_s14 = ssub.s32 %s4625_s30, %s6119_s9  ;;  %s130_s16 = sadd.s32 1, %s4597_s23 }
  0x1f   : > { %6041 = sst [smem:[#allocation23_spill]] %s4765_s13  ;;  %s127_s15 = sor.u32 %s4770_s14, %s73_s11 }
  0x20   : > { %p4776_p8 = por %p6023_p7, %p89_p6  ;;  %p128_p9 = scmp.eq.s32.totalorder %s127_s15, 0 }
  0x21   : > { %p137_p10 = scmp.ne.s32.totalorder %s4597_s23, %s4593_s22  ;;  %p143_p11 = scmp.ne.s32.totalorder %s4593_s22, %s4589_s21 }
  0x22   : > { %s6042_s17 = scalar_select %p4776_p8, 1, 0 }
  0x23   : > { %s4785_s24 = scalar_select %p128_p9, %s4597_s23, %s130_s16  }
  0x24   : > { %6043 = sst [smem:[#allocation24_spill]] %s6042_s17  ;;  %p4789_p12 = por %p137_p10, %p84_p2 }
  0x25   : > { %6044 = sst [smem:[#allocation25_spill]] %s4785_s24  ;;  %p4795_p13 = por %p143_p11, %p6023_p7 }
  0x26   : > { %p6022_p0 = scmp.lt.s32.totalorder %s4629_s6, 6  ;;  %s4801_s9 = sand.u32 1, %s4609_s26  }
  0x27   : > { %s6046_s11 = scalar_select %p4795_p13, 1, 0 }
  0x28   : > { %s252_s21 = sand.u32 1, %s4629_s6   ;;  %s3941_s15 = smul.u32 1152, %s4801_s9 }
  0x29   : > { %6047 = sst [smem:[#allocation26_spill]] %s6046_s11  ;;  %p4809_p1 = pnand %p6022_p0, %p4757_p5 }
  0x2a   : > { %s3942_s8 = smul.u32 6, %s4801_s9  ;;  %s235_s13 = scalar_lea.vmem [#allocation3], %s3941_s15 }
  0x2b   : > { %s242_s24 = sshll.u32 %s235_s13, 4  ;;  %s3669_s5 = smul.u32 96, %s4621_s29  ;;  %s4814_s24 = int_to_ptr.vmem [resolvable:$true] %s242_s24 }
  0x2c   : > { %s256_s26 = scalar_lea.vmem [#allocation5], %s3942_s8  ;;  %s6049_s2 = sld [smem:[#allocation42_spill]] }
  0x2d   : > { %s264_s28 = sshll.u32 %s256_s26, 4  ;;  %p4825_p3 = pnand %p6022_p0, %p4789_p12  ;;  %s265_s28 = int_to_ptr.vmem [resolvable:$true] %s264_s28 }
  0x2e   : > { %s4829_s17 = scalar_lea.sflag [#allocation6], %s252_s21  ;;  %p4393_p4 = pneg %p4809_p1 }
  0x2f   : > { %s4404_s13 = scalar_lea.vmem %s265_s28, 96  ;;  %s4631_s26 = smov [#allocation5]  }
  0x30   : > { %p4405_p5 = scmp.ne.s32.totalorder %s265_s28, %s4404_s13  ;;  %s4409_s8 = sshll.u32 %s4631_s26, 4  ;;  %s4410_s8 = int_to_ptr.vmem [resolvable:$false] %s4409_s8 }
  0x31   : > { %p4412_p10 = scmp.lt.s32.totalorder %s265_s28, %s4410_s8 }
  0x32   : > { %s262_s12 = scalar_lea.hbm %s6049_s2, %s3669_s5  ;;  %p4407_p6 = pnand %p4405_p5, %p4393_p4 }
  0x33   : > { %s4411_s5 = scalar_lea.vmem %s4410_s8, 192 }
  0x34   : > { %p4408_p9 = pneg %p4407_p6  ;;  %p4413_p11 = scmp.lt.s32.totalorder %s4411_s5, %s4404_s13 }
  0x36   : > { %p4414_p12 = por %p4413_p11, %p4412_p10 }
  0x38   : > { %p4415_p0 = pnand %p4414_p12, %p4408_p9 }
  0x3a   : > { %4418 = shalt.err (!%p4415_p0)
}
  0x3b   : > { %3962 = dma.hbm_to_vmem [thread:$0]  (!%p4809_p1), %s262_s12, 96, %s265_s28, %s4829_s17  }
  0x3c   : > { %p3427_p5 = scmp.ge.s32.totalorder %s4629_s6, 1  ;;  %p309_p6 = scmp.lt.s32.totalorder %s4629_s6, 7 }
  0x3d   : > { %s3668_s10 = smul.u32 384, %s4621_s29  ;;  %s6053_s1 = sld [smem:[#allocation41_spill]] }
  0x3e   : > { %p4841_p7 = pnand %p3427_p5, %p309_p6  ;;  %s273_s13 = sand.u32 1, %s4597_s23  }
  0x3f   : > { %s232_s26 = scalar_lea.sflag [#allocation4], %s4801_s9  ;;  %s4432_s8 = scalar_lea.vmem %s4814_s24, 18432 }
  0x40   : > { %s6051_s27 = scalar_select %p4841_p7, 1, 0 }
  0x41   : > { %p4433_p0 = scmp.ne.s32.totalorder %s4814_s24, %s4432_s8  ;;  %s4632_s28 = smov [#allocation3]  }
  0x42   : > { %6052 = sst [smem:[#allocation27_spill]] %s6051_s27  ;;  %s4437_s12 = sshll.u32 %s4632_s28, 4  ;;  %s4438_s12 = int_to_ptr.vmem [resolvable:$false] %s4437_s12 }
  0x43   : > { %s241_s15 = scalar_lea.hbm %s6053_s1, %s3668_s10  ;;  %p4435_p9 = pnand %p4433_p0, %p4393_p4 }
  0x44   : > { %s4439_s5 = scalar_lea.vmem %s4438_s12, 36864  ;;  %p4440_p11 = scmp.lt.s32.totalorder %s4814_s24, %s4438_s12 }
  0x45   : > { %p4436_p10 = pneg %p4435_p9  ;;  %p4441_p12 = scmp.lt.s32.totalorder %s4439_s5, %s4432_s8 }
  0x47   : > { %p4442_p5 = por %p4441_p12, %p4440_p11 }
  0x49   : > { %p4443_p6 = pnand %p4442_p5, %p4436_p10 }
  0x4b   : > { %4446 = shalt.err (!%p4443_p6)
}
  0x4c   : > { %s4633_s0 = smov 768   ;;  %s4634_s9 = smov 384  }
  0x4d   : > { %s4635_s10 = smov 24   ;;  %s3943_s11 = smul.u32 384, %s273_s13 }
  0x4e   : > { %3959 = dma.hbm_to_vmem [thread:$0]  (!%p4809_p1), %s241_s15, 18432, %s4814_s24, %s232_s26, %s4633_s0, %s4634_s9, %s4635_s10  }
  0x4f   : > { %s6054_s21 = smul.u32 288, %s4621_s29  ;;  %s275_s5 = scalar_lea.vmem [#allocation7], %s3943_s11 }
  0x50   : > { %s284_s23 = sshll.u32 %s275_s5, 4  ;;  %p4449_p4 = pneg %p4825_p3  ;;  %s285_s23 = int_to_ptr.vmem [resolvable:$true] %s284_s23 }
  0x51   : > { %s281_s28 = sadd.s32 %s4625_s30, %s6054_s21  ;;  %s4460_s25 = scalar_lea.vmem %s285_s23, 6144 }
  0x52   : > { %s3425_s1 = sshll.u32 %s281_s28, 6  ;;  %p4461_p0 = scmp.ne.s32.totalorder %s285_s23, %s4460_s25 }
  0x53   : > { %s283_s8 = scalar_lea.hbm %s6010_s3, %s3425_s1  ;;  %s4636_s27 = smov [#allocation7]  }
  0x54   : > { %p4463_p9 = pnand %p4461_p0, %p4449_p4  ;;  %s4465_s16 = sshll.u32 %s4636_s27, 4  ;;  %s4466_s16 = int_to_ptr.vmem [resolvable:$false] %s4465_s16 }
  0x55   : > { %s4467_s0 = scalar_lea.vmem %s4466_s16, 12288  ;;  %p4468_p1 = scmp.lt.s32.totalorder %s285_s23, %s4466_s16 }
  0x56   : > { %p4464_p10 = pneg %p4463_p9  ;;  %p4469_p11 = scmp.lt.s32.totalorder %s4467_s0, %s4460_s25 }
  0x58   : > { %p4470_p12 = por %p4469_p11, %p4468_p1 }
  0x5a   : > { %p4471_p5 = pnand %p4470_p12, %p4464_p10 }
  0x5c   : > { %4474 = shalt.err (!%p4471_p5)
}
  0x5d   : > { %s4637_s2 = smov 192   ;;  %s4638_s1 = smov 64  }
  0x5e   : > { %s4639_s25 = smov 4   ;;  %p154_p6 = scmp.eq.s32.totalorder %s4770_s14, 0 }
  0x5f   : > { %3965 = dma.hbm_to_vmem [thread:$0]  (!%p4825_p3), %s283_s8, 6144, %s285_s23, %s4829_s17, %s4637_s2, %s4638_s1, %s4639_s25  }
  0x60   : > { %s156_s24 = sadd.s32 1, %s4585_s20  ;;  %p163_p4 = scmp.ne.s32.totalorder %s4585_s20, %s4581_s19 }
  0x61   : > { %p169_p0 = scmp.ne.s32.totalorder %s4581_s19, %s4577_s18  ;;  %p6055_p10 = scmp.eq.s32.totalorder %s4742_s7, 0 }
  0x62   : > { %s4878_s27 = scalar_select %p154_p6, %s4585_s20, %s156_s24  }
  0x63   : > { %p165_p9 = por %p163_p4, %p84_p2  ;;  %p4884_p1 = por %p169_p0, %p6055_p10 }
  0x64   : > { %p195_p11 = scmp.eq.s32.totalorder %s4742_s7, 5  ;;  %s294_s13 = sand.u32 1, %s4585_s20  }
  0x65   : > { %s6056_s15 = scalar_select %p4884_p1, 1, 0 }
  0x66   : > { %p4890_p12 = por %p195_p11, %p163_p4  ;;  %s3426_s22 = sshll.u32 %s4625_s30, 4 }
  0x67   : > { %s302_s18 = scalar_lea.hbm %s6011_s4, %s3426_s22  ;;  %s297_s17 = scalar_lea.vmem [#allocation8], %s294_s13 }
  0x68   : > { %s6057_s26 = scalar_select %p4890_p12, 1, 0 }
  0x69   : > { %s304_s9 = sshll.u32 %s297_s17, 4  ;;  %p6058_p2 = scmp.lt.s32.totalorder %s4629_s6, 6  ;;  %s305_s9 = int_to_ptr.vmem [resolvable:$true] %s304_s9 }
  0x6a   : > { %s295_s11 = scalar_lea.sflag [#allocation9], %s294_s13  ;;  %s4488_s21 = scalar_lea.vmem %s305_s9, 16 }
  0x6b   : > { %p4900_p3 = pnand %p6058_p2, %p165_p9  ;;  %p4489_p6 = scmp.ne.s32.totalorder %s305_s9, %s4488_s21 }
  0x6c   : > { %s4640_s28 = smov [#allocation8]  }
  0x6d   : > { %p4477_p5 = pneg %p4900_p3  ;;  %s4493_s12 = sshll.u32 %s4640_s28, 4  ;;  %s4494_s12 = int_to_ptr.vmem [resolvable:$false] %s4493_s12 }
  0x6e   : > { %s4495_s8 = scalar_lea.vmem %s4494_s12, 32  ;;  %p4496_p10 = scmp.lt.s32.totalorder %s305_s9, %s4494_s12 }
  0x6f   : > { %p4491_p4 = pnand %p4489_p6, %p4477_p5  ;;  %p4497_p11 = scmp.lt.s32.totalorder %s4495_s8, %s4488_s21 }
  0x71   : > { %p4492_p0 = pneg %p4491_p4  ;;  %p4498_p12 = por %p4497_p11, %p4496_p10 }
  0x73   : > { %p4499_p1 = pnand %p4498_p12, %p4492_p0 }
  0x75   : > { %4502 = shalt.err (!%p4499_p1)
}
  0x76   : > { %3968 = dma.hbm_to_vmem [thread:$0]  (!%p4900_p3), %s302_s18, 16, %s305_s9, %s295_s11  }
  0x77   : > { %313 = sbr.rel (%p4841_p7) target bundleno = 865 (0x361), region = 40 }
  0x7c   : > { %s6061_s16 = sld [smem:[#allocation17_spill]] }
  0x82   : > { %s315_s2 = sand.u32 1, %s6061_s16  }
  0x83   : > { %s3945_s1 = smul.u32 1152, %s315_s2  ;;  %s316_s25 = scalar_lea.sflag [#allocation4], %s315_s2 }
  0x85   : > { %s4911_s24 = scalar_lea.vmem [#allocation3], %s3945_s1 }
  0x86   : > { %4560 = dma.done.wait (%p4776_p8), %s316_s25, 18432  }
  0x87   : > { %4562 = vsyncadd (%p4776_p8), %s316_s25, 4294948864  ;;  %s324_s13 = sand.u32 1, %s4742_s7   ;;  %s3946_s22 = smul.u32 6, %s315_s2 }
  0x88   : > { %s325_s23 = scalar_lea.sflag [#allocation6], %s324_s13 }
  0x89   : > { %s4918_s14 = scalar_lea.vmem [#allocation5], %s3946_s22 }
  0x8a   : > { %4564 = dma.done.wait (%p4776_p8), %s325_s23, 96  }
  0x8b   : > { %4566 = vsyncadd (%p4776_p8), %s325_s23, 4294967200  ;;  %s6063_s18 = sld [smem:[#allocation15_spill]] }
  0x91   : > { %s335_s9 = sand.u32 1, %s6063_s18  }
  0x92   : > { %s3947_s10 = smul.u32 384, %s335_s9 }
  0x94   : > { %s4925_s11 = scalar_lea.vmem [#allocation7], %s3947_s10 }
  0x95   : > { %4568 = dma.done.wait (%p4795_p13), %s325_s23, 6144  }
  0x96   : > { %4570 = vsyncadd (%p4795_p13), %s325_s23, 4294961152  ;;  %s4932_s7 = sand.u32 1, %s4581_s19   ;;  %p6065_p7 = scmp.ne.s32.totalorder %s6056_s15, 0 }
  0x97   : > { %s343_s21 = scalar_lea.sflag [#allocation9], %s4932_s7  ;;  %s345_s28 = scalar_lea.vmem [#allocation8], %s4932_s7 }
  0x98   : > { %4572 = dma.done.wait (%p6065_p7), %s343_s21, 16  }
  0x99   : > { %4574 = vsyncadd (%p6065_p7), %s343_s21, 4294967280  ;;  %s3428_s12 = sshll.u32 %s4932_s7, 6  ;;  %s6066_s5 = sld [smem:[#allocation19_spill]] }
  0x9a   : > { %s4941_s8 = scalar_lea.vmem [#allocation10], %s3428_s12 }
  0x9f   : > { %p3429_p8 = scmp.ne.s32.totalorder %s6066_s5, 0 }
  0xa1   : > { %406 = sbr.rel (%p3429_p8) target bundleno = 175 (0xaf), region = 60 }
  0xa6   : > { %v4641_v0 = vmov 0.0  }
  0xa7   : > { %407 = vst [vmem:[#allocation2 + $0x30] sm:$0xff] %v4641_v0  ;;  %408 = vst [vmem:[#allocation2] sm:$0xff] %v4641_v0 }
  0xa8   : > { %409 = vst [vmem:[#allocation2 + $0x58] sm:$0xff] %v4641_v0  ;;  %410 = vst [vmem:[#allocation2 + $0x18] sm:$0xff] %v4641_v0 }
  0xa9   : > { %411 = vst [vmem:[#allocation2 + $0x50] sm:$0xff] %v4641_v0  ;;  %412 = vst [vmem:[#allocation2 + $0x68] sm:$0xff] %v4641_v0 }
  0xaa   : > { %413 = vst [vmem:[#allocation2 + $0x8] sm:$0xff] %v4641_v0  ;;  %414 = vst [vmem:[#allocation2 + $0x48] sm:$0xff] %v4641_v0 }
  0xab   : > { %415 = vst [vmem:[#allocation2 + $0x40] sm:$0xff] %v4641_v0  ;;  %416 = vst [vmem:[#allocation2 + $0x20] sm:$0xff] %v4641_v0 }
  0xac   : > { %417 = vst [vmem:[#allocation2 + $0x10] sm:$0xff] %v4641_v0  ;;  %418 = vst [vmem:[#allocation2 + $0x38] sm:$0xff] %v4641_v0 }
  0xad   : > { %419 = vst [vmem:[#allocation2 + $0x60] sm:$0xff] %v4641_v0  ;;  %420 = vst [vmem:[#allocation2 + $0x70] sm:$0xff] %v4641_v0 }
  0xae   : > { %421 = vst [vmem:[#allocation2 + $0x78] sm:$0xff] %v4641_v0  ;;  %422 = vst [vmem:[#allocation2 + $0x28] sm:$0xff] %v4641_v0 }
  0xaf PF: > { %v4091_v1 = vld [vmem:[%s4911_s24 + $0x154] ss:$24 sps:$4 sm:$0xff]   ;;  %v4093_v2 = vld [vmem:[%s4911_s24 + $0x150] ss:$24 sps:$4 sm:$0xff]   ;;  %v4642_v3 = vmov 0   ;;  %s6067_s0 = sld [smem:[#allocation40_spill]] }
  0xb0   : > { %1624 = vmatprep.mubr.bf16.mxu1 %v4642_v3  ;;  %1479 = vmatprep.subr.bf16.mxu0 %v4091_v1  ;;  %v4094_v4 = vld [vmem:[%s4911_s24 + $0x124] ss:$24 sps:$4 sm:$0xff]   ;;  %v4096_v5 = vld [vmem:[%s4911_s24 + $0x120] ss:$24 sps:$4 sm:$0xff]   ;;  %v4097_v6 = vld [vmem:[%s4911_s24 + $0xf4] ss:$24 sps:$4 sm:$0xff]  }
  0xb1   : > { %1480 = vmatpush1.bf16.msra.mxu0 %v4093_v2  ;;  %v4099_v7 = vld [vmem:[%s4911_s24 + $0xf0] ss:$24 sps:$4 sm:$0xff]   ;;  %v4100_v8 = vld [vmem:[%s4911_s24 + $0xc4] ss:$24 sps:$4 sm:$0xff]   ;;  %v4112_v9 = vld [vmem:[%s4911_s24 + $0x454] ss:$24 sps:$4 sm:$0xff]  }
  0xb2   : > { %1481 = vmatprep.subr.bf16.mxu0 %v4094_v4  ;;  %v4114_v10 = vld [vmem:[%s4911_s24 + $0x450] ss:$24 sps:$4 sm:$0xff]   ;;  %v4102_v11 = vld [vmem:[%s4911_s24 + $0xc0] ss:$24 sps:$4 sm:$0xff]   ;;  %v4103_v12 = vld [vmem:[%s4911_s24 + $0x94] ss:$24 sps:$4 sm:$0xff]   ;;  %1592 = vmatprep.subr.bf16.mxu1 %v4112_v9 }
  0xb3   : > { %v4118_v13 = vld [vmem:[%s4911_s24 + $0x424] ss:$24 sps:$4 sm:$0xff]   ;;  %1593 = vmatpush1.bf16.msra.mxu1 %v4114_v10  ;;  %v4120_v14 = vld [vmem:[%s4911_s24 + $0x420] ss:$24 sps:$4 sm:$0xff]   ;;  %v4105_v15 = vld [vmem:[%s4911_s24 + $0x90] ss:$24 sps:$4 sm:$0xff]  }
  0xb4   : > { %1594 = vmatprep.subr.bf16.mxu1 %v4118_v13  ;;  %v4124_v16 = vld [vmem:[%s4911_s24 + $0x3f4] ss:$24 sps:$4 sm:$0xff]   ;;  %v4106_v17 = vld [vmem:[%s4911_s24 + $0x64] ss:$24 sps:$4 sm:$0xff]   ;;  %v4126_v18 = vld [vmem:[%s4911_s24 + $0x3f0] ss:$24 sps:$4 sm:$0xff]  }
  0xb5   : > { %1482 = vmatpush1.bf16.msra.mxu0 %v4096_v5  ;;  %v4130_v19 = vld [vmem:[%s4911_s24 + $0x3c4] ss:$24 sps:$4 sm:$0xff]   ;;  %v4108_v20 = vld [vmem:[%s4911_s24 + $0x60] ss:$24 sps:$4 sm:$0xff]   ;;  %v4109_v21 = vld [vmem:[%s4911_s24 + $0x34] ss:$24 sps:$4 sm:$0xff]  }
  0xb6   : > { %1483 = vmatprep.subr.bf16.mxu0 %v4097_v6  ;;  %v4132_v22 = vld [vmem:[%s4911_s24 + $0x3c0] ss:$24 sps:$4 sm:$0xff]   ;;  %v4136_v23 = vld [vmem:[%s4911_s24 + $0x394] ss:$24 sps:$4 sm:$0xff]   ;;  %v4111_v24 = vld [vmem:[%s4911_s24 + $0x30] ss:$24 sps:$4 sm:$0xff]  }
  0xb7   : > { %1595 = vmatpush1.bf16.msra.mxu1 %v4120_v14  ;;  %v4115_v25 = vld [vmem:[%s4911_s24 + $0x4] ss:$24 sps:$4 sm:$0xff]   ;;  %v4138_v26 = vld [vmem:[%s4911_s24 + $0x390] ss:$24 sps:$4 sm:$0xff]   ;;  %v4117_v28 = vld [vmem:[%s4911_s24] ss:$24 sps:$4 sm:$0xff]  }
  0xb8   : > { %1596 = vmatprep.subr.bf16.mxu1 %v4124_v16  ;;  %v4142_v27 = vld [vmem:[%s4911_s24 + $0x364] ss:$24 sps:$4 sm:$0xff]   ;;  %v4121_v29 = vld [vmem:[%s4911_s24 + $0x2d4] ss:$24 sps:$4 sm:$0xff]   ;;  %v4144_v30 = vld [vmem:[%s4911_s24 + $0x360] ss:$24 sps:$4 sm:$0xff]  }
  0xb9   : > { %1484 = vmatpush1.bf16.msra.mxu0 %v4099_v7  ;;  %v4148_v31 = vld [vmem:[%s4911_s24 + $0x334] ss:$24 sps:$4 sm:$0xff]   ;;  %v4123_v32 = vld [vmem:[%s4911_s24 + $0x2d0] ss:$24 sps:$4 sm:$0xff]   ;;  %v4127_v33 = vld [vmem:[%s4911_s24 + $0x2a4] ss:$24 sps:$4 sm:$0xff]  }
  0xba   : > { %1485 = vmatprep.subr.bf16.mxu0 %v4100_v8  ;;  %v4150_v34 = vld [vmem:[%s4911_s24 + $0x330] ss:$24 sps:$4 sm:$0xff]   ;;  %v4154_v35 = vld [vmem:[%s4911_s24 + $0x304] ss:$24 sps:$4 sm:$0xff]   ;;  %v4129_v36 = vld [vmem:[%s4911_s24 + $0x2a0] ss:$24 sps:$4 sm:$0xff]  }
  0xbb   : > { %1597 = vmatpush1.bf16.msra.mxu1 %v4126_v18  ;;  %v4133_v37 = vld [vmem:[%s4911_s24 + $0x274] ss:$24 sps:$4 sm:$0xff]   ;;  %v4984_v38 = vld [vmem:[%s6067_s0 + $0x4] ss:$12 sps:$4 sm:$0xff]   ;;  %v4156_v39 = vld [vmem:[%s4911_s24 + $0x300] ss:$24 sps:$4 sm:$0xff]  }
  0xbc   : > { %1598 = vmatprep.subr.bf16.mxu1 %v4130_v19  ;;  %v4163_v40 = vld [vmem:[%s4911_s24 + $0x15c] ss:$24 sps:$4 sm:$0xff]   ;;  %1511 = vmatprep.mubr.bf16.mxu0 %v4984_v38  ;;  %v4135_v41 = vld [vmem:[%s4911_s24 + $0x270] ss:$24 sps:$4 sm:$0xff]   ;;  %v4169_v45 = vld [vmem:[%s4911_s24 + $0x12c] ss:$24 sps:$4 sm:$0xff]  }
  0xbd   : > { %1486 = vmatpush1.bf16.msra.mxu0 %v4102_v11  ;;  %v4139_v42 = vld [vmem:[%s4911_s24 + $0x244] ss:$24 sps:$4 sm:$0xff]   ;;  %v4994_v43 = vld [vmem:[%s6067_s0 + $0x8] ss:$12 sps:$4 sm:$0xff]   ;;  %v4161_v44 = vld [vmem:[%s4911_s24 + $0x158] ss:$24 sps:$4 sm:$0xff]  }
  0xbe   : > { %1487 = vmatprep.subr.bf16.mxu0 %v4103_v12  ;;  %v4141_v46 = vld [vmem:[%s4911_s24 + $0x240] ss:$24 sps:$4 sm:$0xff]   ;;  %v4145_v47 = vld [vmem:[%s4911_s24 + $0x214] ss:$24 sps:$4 sm:$0xff]   ;;  %v4147_v49 = vld [vmem:[%s4911_s24 + $0x210] ss:$24 sps:$4 sm:$0xff]  }
  0xbf   : > { %1599 = vmatpush1.bf16.msra.mxu1 %v4132_v22  ;;  %v4167_v48 = vld [vmem:[%s4911_s24 + $0x128] ss:$24 sps:$4 sm:$0xff]   ;;  %v4179_v50 = vld [vmem:[%s4911_s24 + $0xfc] ss:$24 sps:$4 sm:$0xff]   ;;  %v4177_v53 = vld [vmem:[%s4911_s24 + $0xf8] ss:$24 sps:$4 sm:$0xff]  }
  0xc0   : > { %1600 = vmatprep.subr.bf16.mxu1 %v4136_v23  ;;  %v4151_v51 = vld [vmem:[%s4911_s24 + $0x1e4] ss:$24 sps:$4 sm:$0xff]   ;;  %v5009_v52 = vld [vmem:[%s6067_s0 + $0x20] ss:$12 sps:$4 sm:$0xff]   ;;  %v4159_v59 = vld [vmem:[%s4911_s24 + $0x1b0] ss:$24 sps:$4 sm:$0xff]  }
  0xc1   : > { %1488 = vmatpush1.bf16.msra.mxu0 %v4105_v15  ;;  %v4182_v54 = vld [vmem:[%s4911_s24 + $0xcc] ss:$24 sps:$4 sm:$0xff]   ;;  %v4153_v55 = vld [vmem:[%s4911_s24 + $0x1e0] ss:$24 sps:$4 sm:$0xff]   ;;  %v4192_v58 = vld [vmem:[%s4911_s24 + $0x9c] ss:$24 sps:$4 sm:$0xff]  }
  0xc2   : > { %1489 = vmatprep.subr.bf16.mxu0 %v4106_v17  ;;  %v4157_v56 = vld [vmem:[%s4911_s24 + $0x1b4] ss:$24 sps:$4 sm:$0xff]   ;;  %v4180_v57 = vld [vmem:[%s4911_s24 + $0xc8] ss:$24 sps:$4 sm:$0xff]   ;;  %v4164_v60 = vld [vmem:[%s4911_s24 + $0x184] ss:$24 sps:$4 sm:$0xff]  }
  0xc3   : > { %1601 = vmatpush1.bf16.msra.mxu1 %v4138_v26  ;;  %v5024_v61 = vld [vmem:[%s6067_s0 + $0x38] ss:$12 sps:$4 sm:$0xff]   ;;  %v5032_v1 = vld [vmem:[%s6067_s0] ss:$12 sps:$4 sm:$0xff]   ;;  %v4175_v2 = vld [vmem:[%s4911_s24 + $0x45c] ss:$24 sps:$4 sm:$0xff]  }
  0xc4   : > { %1602 = vmatprep.subr.bf16.mxu1 %v4142_v27  ;;  %v4190_v62 = vld [vmem:[%s4911_s24 + $0x98] ss:$24 sps:$4 sm:$0xff]   ;;  %v4195_v63 = vld [vmem:[%s4911_s24 + $0x6c] ss:$24 sps:$4 sm:$0xff]   ;;  %v4193_v5 = vld [vmem:[%s4911_s24 + $0x68] ss:$24 sps:$4 sm:$0xff]  }
  0xc5   : > { %1490 = vmatpush1.bf16.msra.mxu0 %v4108_v20  ;;  %v4166_v0 = vld [vmem:[%s4911_s24 + $0x180] ss:$24 sps:$4 sm:$0xff]   ;;  %v4205_v6 = vld [vmem:[%s4911_s24 + $0x3c] ss:$24 sps:$4 sm:$0xff]   ;;  %v4188_v8 = vld [vmem:[%s4911_s24 + $0x42c] ss:$24 sps:$4 sm:$0xff]  }
  0xc6   : > { %1491 = vmatprep.subr.bf16.mxu0 %v4109_v21  ;;  %v4173_v4 = vld [vmem:[%s4911_s24 + $0x458] ss:$24 sps:$4 sm:$0xff]   ;;  %v5043_v7 = vld [vmem:[%s6067_s0 + $0x1c] ss:$12 sps:$4 sm:$0xff]   ;;  %v4208_v11 = vld [vmem:[%s4911_s24 + $0xc] ss:$24 sps:$4 sm:$0xff]  }
  0xc7   : > { %1603 = vmatpush1.bf16.msra.mxu1 %v4144_v30  ;;  %v5049_v9 = vld [vmem:[%s6067_s0 + $0x50] ss:$12 sps:$4 sm:$0xff]   ;;  %v4186_v12 = vld [vmem:[%s4911_s24 + $0x428] ss:$24 sps:$4 sm:$0xff]   ;;  %v5059_v13 = vld [vmem:[%s6067_s0 + $0x18] ss:$12 sps:$4 sm:$0xff]  }
  0xc8   : > { %1604 = vmatprep.subr.bf16.mxu1 %v4148_v31  ;;  %v4203_v10 = vld [vmem:[%s4911_s24 + $0x38] ss:$24 sps:$4 sm:$0xff]   ;;  %v4201_v14 = vld [vmem:[%s4911_s24 + $0x3fc] ss:$24 sps:$4 sm:$0xff]   ;;  %v4206_v17 = vld [vmem:[%s4911_s24 + $0x8] ss:$24 sps:$4 sm:$0xff]  }
  0xc9   : > { %1492 = vmatpush1.bf16.msra.mxu0 %v4111_v24  ;;  %v5066_v15 = vld [vmem:[%s6067_s0 + $0x34] ss:$12 sps:$4 sm:$0xff]   ;;  %v4199_v16 = vld [vmem:[%s4911_s24 + $0x3f8] ss:$24 sps:$4 sm:$0xff]   ;;  %v4214_v19 = vld [vmem:[%s4911_s24 + $0x3cc] ss:$24 sps:$4 sm:$0xff]  }
  0xca   : > { %1493 = vmatprep.subr.bf16.mxu0 %v4115_v25  ;;  %v4218_v18 = vld [vmem:[%s4911_s24 + $0x2dc] ss:$24 sps:$4 sm:$0xff]   ;;  %v4216_v21 = vld [vmem:[%s4911_s24 + $0x2d8] ss:$24 sps:$4 sm:$0xff]   ;;  %v4221_v22 = vld [vmem:[%s4911_s24 + $0x2ac] ss:$24 sps:$4 sm:$0xff]  }
  0xcb   : > { %1605 = vmatpush1.bf16.msra.mxu1 %v4150_v34  ;;  %v5076_v20 = vld [vmem:[%s6067_s0 + $0x68] ss:$12 sps:$4 sm:$0xff]   ;;  %v5086_v24 = vld [vmem:[%s6067_s0 + $0x30] ss:$12 sps:$4 sm:$0xff]   ;;  %v5095_v27 = vld [vmem:[%s6067_s0 + $0x4c] ss:$12 sps:$4 sm:$0xff]  }
  0xcc   : > { %1606 = vmatprep.subr.bf16.mxu1 %v4154_v35  ;;  %v4212_v23 = vld [vmem:[%s4911_s24 + $0x3c8] ss:$24 sps:$4 sm:$0xff]   ;;  %v4227_v25 = vld [vmem:[%s4911_s24 + $0x39c] ss:$24 sps:$4 sm:$0xff]   ;;  %v4240_v31 = vld [vmem:[%s4911_s24 + $0x36c] ss:$24 sps:$4 sm:$0xff]  }
  0xcd   : > { %1494 = vmatpush1.bf16.msra.mxu0 %v4117_v28  ;;  %v4219_v26 = vld [vmem:[%s4911_s24 + $0x2a8] ss:$24 sps:$4 sm:$0xff]   ;;  %v4231_v28 = vld [vmem:[%s4911_s24 + $0x27c] ss:$24 sps:$4 sm:$0xff]  }
  0xce   : > { %1495 = vmatprep.subr.bf16.mxu0 %v4121_v29  ;;  %v4225_v29 = vld [vmem:[%s4911_s24 + $0x398] ss:$24 sps:$4 sm:$0xff]   ;;  %v5102_v30 = vld [vmem:[%s6067_s0 + $0x80] ss:$12 sps:$4 sm:$0xff]   ;;  %v5113_v35 = vld [vmem:[%s6067_s0 + $0x48] ss:$12 sps:$4 sm:$0xff]  }
  0xcf   : > { %1607 = vmatpush1.bf16.msra.mxu1 %v4156_v39  ;;  %v4238_v34 = vld [vmem:[%s4911_s24 + $0x368] ss:$24 sps:$4 sm:$0xff]   ;;  %v5122_v39 = vld [vmem:[%s6067_s0 + $0x64] ss:$12 sps:$4 sm:$0xff]  }
  0xd0   : > { %1705 = vmatprep.subr.bf16.mxu1 %v4163_v40  ;;  %v4244_v40 = vld [vmem:[%s4911_s24 + $0x21c] ss:$24 sps:$4 sm:$0xff]  }
  0xd1   : > { %1496 = vmatpush2.bf16.msra.mxu0 %v4123_v32  ;;  %v4229_v32 = vld [vmem:[%s4911_s24 + $0x278] ss:$24 sps:$4 sm:$0xff]  }
  0xd2   : > { %1497 = vmatprep.subr.bf16.mxu0 %v4127_v33  ;;  %1625 = vmatmul.mubr.bf16.vlgmr.msra.gmra.mxu1 %v4994_v43  ;;  %v4234_v33 = vld [vmem:[%s4911_s24 + $0x24c] ss:$24 sps:$4 sm:$0xff]  }
  0xd3   : > { %1706 = vmatpush1.bf16.msra.mxu1 %v4161_v44  ;;  %1634 = vmatprep.mubr.bf16.mxu1 %v4642_v3  ;;  %v4266_v44 = vld [vmem:[%s4911_s24 + $0x30c] ss:$24 sps:$4 sm:$0xff]  }
  0xd4   : > { %1707 = vmatprep.subr.bf16.mxu1 %v4169_v45  ;;  %v4242_v45 = vld [vmem:[%s4911_s24 + $0x218] ss:$24 sps:$4 sm:$0xff]  }
  0xd5   : > { %1498 = vmatpush2.bf16.msra.mxu0 %v4129_v36  ;;  %v4253_v36 = vld [vmem:[%s4911_s24 + $0x33c] ss:$24 sps:$4 sm:$0xff]  }
  0xd6   : > { %1499 = vmatprep.subr.bf16.mxu0 %v4133_v37  ;;  %v4232_v37 = vld [vmem:[%s4911_s24 + $0x248] ss:$24 sps:$4 sm:$0xff]  }
  0xd7   : > { %1708 = vmatpush1.bf16.msra.mxu1 %v4167_v48  ;;  %v4275_v48 = vld [vmem:[%s4911_s24 + $0x464] ss:$24 sps:$4 sm:$0xff]  }
  0xd8   : > { %1709 = vmatprep.subr.bf16.mxu1 %v4179_v50  ;;  %v5144_v50 = vld [vmem:[%s6067_s0 + $0x60] ss:$12 sps:$4 sm:$0xff]  }
  0xd9   : > { %1500 = vmatpush2.bf16.msra.mxu0 %v4135_v41  ;;  %v5128_v41 = vld [vmem:[%s6067_s0 + $0x98] ss:$12 sps:$4 sm:$0xff]  }
  0xda   : > { %1501 = vmatprep.subr.bf16.mxu0 %v4139_v42  ;;  %1635 = vmatmul.mubr.bf16.gmra.mxu1 %v5009_v52  ;;  %v4251_v42 = vld [vmem:[%s4911_s24 + $0x338] ss:$24 sps:$4 sm:$0xff]  }
  0xdb   : > { %1710 = vmatpush1.bf16.msra.mxu1 %v4177_v53  ;;  %1644 = vmatprep.mubr.bf16.mxu1 %v4642_v3  ;;  %v5150_v53 = vld [vmem:[%s6067_s0 + $0x7c] ss:$12 sps:$4 sm:$0xff]  }
  0xdc   : > { %1711 = vmatprep.subr.bf16.mxu1 %v4182_v54  ;;  %v5155_v54 = vld [vmem:[%s6067_s0 + $0xb0] ss:$12 sps:$4 sm:$0xff]  }
  0xdd   : > { %1502 = vmatpush2.bf16.msra.mxu0 %v4141_v46  ;;  %v4247_v46 = vld [vmem:[%s4911_s24 + $0x1ec] ss:$24 sps:$4 sm:$0xff]  }
  0xde   : > { %1503 = vmatprep.subr.bf16.mxu0 %v4145_v47  ;;  %v4264_v47 = vld [vmem:[%s4911_s24 + $0x308] ss:$24 sps:$4 sm:$0xff]  }
  0xdf   : > { %1712 = vmatpush1.bf16.msra.mxu1 %v4180_v57  ;;  %v4258_v57 = vld [vmem:[%s4911_s24 + $0x188] ss:$24 sps:$4 sm:$0xff]  }
  0xe0   : > { %1713 = vmatprep.subr.bf16.mxu1 %v4192_v58  ;;  %v5167_v58 = vld [vmem:[%s6067_s0 + $0x78] ss:$12 sps:$4 sm:$0xff]  }
  0xe1   : > { %1504 = vmatpush2.bf16.msra.mxu0 %v4147_v49  ;;  %v4245_v49 = vld [vmem:[%s4911_s24 + $0x1e8] ss:$24 sps:$4 sm:$0xff]  }
  0xe2   : > { %1505 = vmatprep.subr.bf16.mxu0 %v4151_v51  ;;  %1645 = vmatmul.mubr.bf16.gmra.mxu1 %v5024_v61  ;;  %v4257_v51 = vld [vmem:[%s4911_s24 + $0x1bc] ss:$24 sps:$4 sm:$0xff]  }
  0xe3   : > { %1714 = vmatpush1.bf16.msra.mxu1 %v4190_v62  ;;  %1654 = vmatprep.mubr.bf16.mxu1 %v4642_v3  ;;  %v4267_v62 = vld [vmem:[%s4911_s24 + $0x160] ss:$24 sps:$4 sm:$0xff]  }
  0xe4   : > { %1715 = vmatprep.subr.bf16.mxu1 %v4195_v63  ;;  %v4270_v63 = vld [vmem:[%s4911_s24 + $0x130] ss:$24 sps:$4 sm:$0xff]  }
  0xe5   : > { %1506 = vmatpush2.bf16.msra.mxu0 %v4153_v55  ;;  %v4255_v55 = vld [vmem:[%s4911_s24 + $0x1b8] ss:$24 sps:$4 sm:$0xff]  }
  0xe6   : > { %1507 = vmatprep.subr.bf16.mxu0 %v4157_v56  ;;  %v4260_v56 = vld [vmem:[%s4911_s24 + $0x18c] ss:$24 sps:$4 sm:$0xff]  }
  0xe7   : > { %1716 = vmatpush1.bf16.msra.mxu1 %v4193_v5  ;;  %v4276_v5 = vld [vmem:[%s4911_s24 + $0x100] ss:$24 sps:$4 sm:$0xff]  }
  0xe8   : > { %1717 = vmatprep.subr.bf16.mxu1 %v4205_v6  ;;  %v4281_v6 = vld [vmem:[%s4911_s24 + $0xd4] ss:$24 sps:$4 sm:$0xff]  }
  0xe9   : > { %1508 = vmatpush2.bf16.msra.mxu0 %v4159_v59  ;;  %v4269_v59 = vld [vmem:[%s4911_s24 + $0x164] ss:$24 sps:$4 sm:$0xff]  }
  0xea   : > { %1509 = vmatprep.subr.bf16.mxu0 %v4164_v60  ;;  %1655 = vmatmul.mubr.bf16.gmra.mxu1 %v5049_v9  ;;  %v5173_v60 = vld [vmem:[%s6067_s0 + $0x94] ss:$12 sps:$4 sm:$0xff]  }
  0xeb   : > { %1718 = vmatpush1.bf16.msra.mxu1 %v4203_v10  ;;  %1664 = vmatprep.mubr.bf16.mxu1 %v4642_v3  ;;  %v4279_v10 = vld [vmem:[%s4911_s24 + $0xd0] ss:$24 sps:$4 sm:$0xff]  }
  0xec   : > { %1719 = vmatprep.subr.bf16.mxu1 %v4208_v11  ;;  %v4287_v11 = vld [vmem:[%s4911_s24 + $0xa4] ss:$24 sps:$4 sm:$0xff]  }
  0xed   : > { %1510 = vmatpush2.bf16.msra.mxu0 %v4166_v0  ;;  %v5185_v0 = vld [vmem:[%s6067_s0 + $0x90] ss:$12 sps:$4 sm:$0xff]  }
  0xee   : > { %1818 = vmatprep.subr.bf16.mxu0 %v4175_v2  ;;  %v4278_v2 = vld [vmem:[%s4911_s24 + $0x104] ss:$24 sps:$4 sm:$0xff]  }
  0xef   : > { %1720 = vmatpush1.bf16.msra.mxu1 %v4206_v17  ;;  %v4273_v17 = vld [vmem:[%s4911_s24 + $0x460] ss:$24 sps:$4 sm:$0xff]  }
  0xf0   : > { %1512 = vmatmul.mubr.bf16.vlgmr.msra.gmra.mxu0 %v5032_v1  ;;  %1721 = vmatprep.subr.bf16.mxu1 %v4218_v18  ;;  %v4284_v18 = vld [vmem:[%s4911_s24 + $0x434] ss:$24 sps:$4 sm:$0xff]  }
  0xf1   : > { %1819 = vmatpush1.bf16.msra.mxu0 %v4173_v4  ;;  %1521 = vmatprep.mubr.bf16.mxu0 %v5043_v7  ;;  %v5191_v4 = vld [vmem:[%s6067_s0 + $0xac] ss:$12 sps:$4 sm:$0xff]  }
  0xf2   : > { %1820 = vmatprep.subr.bf16.mxu0 %v4188_v8  ;;  %1665 = vmatmul.mubr.bf16.gmra.mxu1 %v5076_v20  ;;  %v5200_v8 = vld [vmem:[%s6067_s0 + $0xa8] ss:$12 sps:$4 sm:$0xff]  }
  0xf3   : > { %1722 = vmatpush2.bf16.msra.mxu1 %v4216_v21  ;;  %1674 = vmatprep.mubr.bf16.mxu1 %v4642_v3  ;;  %v4294_v21 = vld [vmem:[%s4911_s24 + $0x40] ss:$24 sps:$4 sm:$0xff]  }
  0xf4   : > { %1723 = vmatprep.subr.bf16.mxu1 %v4221_v22  ;;  %v4282_v22 = vld [vmem:[%s4911_s24 + $0x430] ss:$24 sps:$4 sm:$0xff]  }
  0xf5   : > { %1821 = vmatpush1.bf16.msra.mxu0 %v4186_v12  ;;  %v4285_v12 = vld [vmem:[%s4911_s24 + $0xa0] ss:$24 sps:$4 sm:$0xff]  }
  0xf6   : > { %1822 = vmatprep.subr.bf16.mxu0 %v4201_v14  ;;  %v4290_v14 = vld [vmem:[%s4911_s24 + $0x74] ss:$24 sps:$4 sm:$0xff]  }
  0xf7   : > { %1724 = vmatpush2.bf16.msra.mxu1 %v4219_v26  ;;  %v4297_v26 = vld [vmem:[%s4911_s24 + $0x10] ss:$24 sps:$4 sm:$0xff]  }
  0xf8   : > { %1522 = vmatmul.mubr.bf16.gmra.mxu0 %v5059_v13  ;;  %1725 = vmatprep.subr.bf16.mxu1 %v4231_v28  ;;  %v4291_v28 = vld [vmem:[%s4911_s24 + $0x400] ss:$24 sps:$4 sm:$0xff]  }
  0xf9   : > { %1531 = vmatprep.mubr.bf16.mxu0 %v5066_v15  ;;  %1823 = vmatpush1.bf16.msra.mxu0 %v4199_v16  ;;  %v4288_v16 = vld [vmem:[%s4911_s24 + $0x70] ss:$24 sps:$4 sm:$0xff]  }
  0xfa   : > { %1824 = vmatprep.subr.bf16.mxu0 %v4214_v19  ;;  %1675 = vmatmul.mubr.bf16.gmra.mxu1 %v5102_v30  ;;  %v4296_v19 = vld [vmem:[%s4911_s24 + $0x44] ss:$24 sps:$4 sm:$0xff]  }
  0xfb   : > { %1726 = vmatpush2.bf16.msra.mxu1 %v4229_v32  ;;  %1684 = vmatprep.mubr.bf16.mxu1 %v4642_v3  ;;  %v4300_v32 = vld [vmem:[%s4911_s24 + $0x3d0] ss:$24 sps:$4 sm:$0xff]  }
  0xfc   : > { %1727 = vmatprep.subr.bf16.mxu1 %v4234_v33  ;;  %v4308_v33 = vld [vmem:[%s4911_s24 + $0x2b4] ss:$24 sps:$4 sm:$0xff]  }
  0xfd   : > { %1825 = vmatpush1.bf16.msra.mxu0 %v4212_v23  ;;  %v4299_v23 = vld [vmem:[%s4911_s24 + $0x14] ss:$24 sps:$4 sm:$0xff]  }
  0xfe   : > { %1826 = vmatprep.subr.bf16.mxu0 %v4227_v25  ;;  %v4293_v25 = vld [vmem:[%s4911_s24 + $0x404] ss:$24 sps:$4 sm:$0xff]  }
  0xff   : > { %1728 = vmatpush2.bf16.msra.mxu1 %v4232_v37  ;;  %v4309_v37 = vld [vmem:[%s4911_s24 + $0x3a0] ss:$24 sps:$4 sm:$0xff]  }
 0x100   : > { %1532 = vmatmul.mubr.bf16.gmra.mxu0 %v5086_v24  ;;  %1729 = vmatprep.subr.bf16.mxu1 %v4244_v40  ;;  %v4314_v40 = vld [vmem:[%s4911_s24 + $0x284] ss:$24 sps:$4 sm:$0xff]  }
 0x101   : > { %1541 = vmatprep.mubr.bf16.mxu0 %v5095_v27  ;;  %1827 = vmatpush1.bf16.msra.mxu0 %v4225_v29  ;;  %v4305_v29 = vld [vmem:[%s4911_s24 + $0x2e4] ss:$24 sps:$4 sm:$0xff]  }
 0x102   : > { %1828 = vmatprep.subr.bf16.mxu0 %v4240_v31  ;;  %1685 = vmatmul.mubr.bf16.gmra.mxu1 %v5128_v41  ;;  %v4303_v31 = vld [vmem:[%s4911_s24 + $0x2e0] ss:$24 sps:$4 sm:$0xff]  }
 0x103   : > { %1730 = vmatpush2.bf16.msra.mxu1 %v4242_v45  ;;  %1694 = vmatprep.mubr.bf16.mxu1 %v4642_v3  ;;  %v4318_v45 = vld [vmem:[%s4911_s24 + $0x370] ss:$24 sps:$4 sm:$0xff]  }
 0x104   : > { %1731 = vmatprep.subr.bf16.mxu1 %v4247_v46  ;;  %v4329_v46 = vld [vmem:[%s4911_s24 + $0x344] ss:$24 sps:$4 sm:$0xff]  }
 0x105   : > { %1829 = vmatpush1.bf16.msra.mxu0 %v4238_v34  ;;  %v4306_v34 = vld [vmem:[%s4911_s24 + $0x2b0] ss:$24 sps:$4 sm:$0xff]  }
 0x106   : > { %1830 = vmatprep.subr.bf16.mxu0 %v4253_v36  ;;  %v4311_v36 = vld [vmem:[%s4911_s24 + $0x3a4] ss:$24 sps:$4 sm:$0xff]  }
 0x107   : > { %1732 = vmatpush2.bf16.msra.mxu1 %v4245_v49  ;;  %v4327_v49 = vld [vmem:[%s4911_s24 + $0x340] ss:$24 sps:$4 sm:$0xff]  }
 0x108   : > { %1542 = vmatmul.mubr.bf16.gmra.mxu0 %v5113_v35  ;;  %1733 = vmatprep.subr.bf16.mxu1 %v4257_v51  ;;  %v4321_v51 = vld [vmem:[%s4911_s24 + $0x220] ss:$24 sps:$4 sm:$0xff]  }
 0x109   : > { %1551 = vmatprep.mubr.bf16.mxu0 %v5122_v39  ;;  %1831 = vmatpush1.bf16.msra.mxu0 %v4251_v42  ;;  %v4312_v42 = vld [vmem:[%s4911_s24 + $0x280] ss:$24 sps:$4 sm:$0xff]  }
 0x10a   : > { %1832 = vmatprep.subr.bf16.mxu0 %v4266_v44  ;;  %1695 = vmatmul.mubr.bf16.gmra.mxu1 %v5155_v54  ;;  %v4317_v44 = vld [vmem:[%s4911_s24 + $0x254] ss:$24 sps:$4 sm:$0xff]  }
 0x10b   : > { %1734 = vmatpush2.bf16.msra.mxu1 %v4255_v55  ;;  %1737 = vmatprep.mubr.bf16.mxu1 %v4984_v38  ;;  %v4272_v38 = vld [vmem:[%s4911_s24 + $0x134] ss:$24 sps:$4 sm:$0xff]  }
 0x10c   : > { %1735 = vmatprep.subr.bf16.mxu1 %v4260_v56  ;;  %v4326_v55 = vld [vmem:[%s4911_s24 + $0x1f4] ss:$24 sps:$4 sm:$0xff]   ;;  %v4336_v56 = vld [vmem:[%s4911_s24 + $0x310] ss:$24 sps:$4 sm:$0xff]  }
 0x10d   : > { %1833 = vmatpush1.bf16.msra.mxu0 %v4264_v47  ;;  %v4315_v47 = vld [vmem:[%s4911_s24 + $0x250] ss:$24 sps:$4 sm:$0xff]  }
 0x10e   : > { %2044 = vmatprep.subr.bf16.mxu0 %v4275_v48  ;;  %v4323_v48 = vld [vmem:[%s4911_s24 + $0x224] ss:$24 sps:$4 sm:$0xff]  }
 0x10f   : > { %1736 = vmatpush2.bf16.msra.mxu1 %v4258_v57  ;;  %v4324_v57 = vld [vmem:[%s4911_s24 + $0x1f0] ss:$24 sps:$4 sm:$0xff]  }
 0x110   : > { %1552 = vmatmul.mubr.bf16.gmra.mxu0 %v5144_v50  ;;  %1931 = vmatprep.subr.bf16.mxu1 %v4269_v59  ;;  %v4332_v59 = vld [vmem:[%s4911_s24 + $0x1c4] ss:$24 sps:$4 sm:$0xff]  }
 0x111   : > { %1561 = vmatprep.mubr.bf16.mxu0 %v5150_v53 }
 0x112   : > { %1738 = vmatmul.mubr.bf16.vlgmr.msra.gmra.mxu1 %v5032_v1 }
 0x113   : > { %1932 = vmatpush1.bf16.msra.mxu1 %v4267_v62  ;;  %1747 = vmatprep.mubr.bf16.mxu1 %v5043_v7  ;;  %v4330_v62 = vld [vmem:[%s4911_s24 + $0x1c0] ss:$24 sps:$4 sm:$0xff]  }
 0x114   : > { %1933 = vmatprep.subr.bf16.mxu1 %v4272_v38  ;;  %v4335_v38 = vld [vmem:[%s4911_s24 + $0x194] ss:$24 sps:$4 sm:$0xff]  }
 0x117   : > { %1934 = vmatpush1.bf16.msra.mxu1 %v4270_v63  ;;  %v4333_v63 = vld [vmem:[%s4911_s24 + $0x190] ss:$24 sps:$4 sm:$0xff]  }
 0x118   : > { %1562 = vmatmul.mubr.bf16.gmra.mxu0 %v5167_v58  ;;  %1935 = vmatprep.subr.bf16.mxu1 %v4278_v2  ;;  %v4387_v2 = vld [vmem:[%s6067_s0 + $0x4] ss:$12 sps:$4 sm:$0xff]  }
 0x119   : > { %1571 = vmatprep.mubr.bf16.mxu0 %v5173_v60 }
 0x11a   : > { %1748 = vmatmul.mubr.bf16.gmra.mxu1 %v5059_v13 }
 0x11b   : > { %1936 = vmatpush1.bf16.msra.mxu1 %v4276_v5  ;;  %1757 = vmatprep.mubr.bf16.mxu1 %v5066_v15  ;;  %v4339_v5 = vld [vmem:[%s4925_s11 + $0x78] sm:$0xff]  }
 0x11c   : > { %1937 = vmatprep.subr.bf16.mxu1 %v4281_v6  ;;  %v4340_v6 = vld [vmem:[%s4925_s11 + $0x38] sm:$0xff]  }
 0x11f   : > { %1938 = vmatpush1.bf16.msra.mxu1 %v4279_v10  ;;  %v4341_v10 = vld [vmem:[%s4925_s11 + $0x70] sm:$0xff]  }
 0x120   : > { %1572 = vmatmul.mubr.bf16.gmra.mxu0 %v5185_v0  ;;  %1939 = vmatprep.subr.bf16.mxu1 %v4287_v11  ;;  %v4342_v11 = vld [vmem:[%s4925_s11 + $0x30] sm:$0xff]  }
 0x121   : > { %1581 = vmatprep.mubr.bf16.mxu0 %v5191_v4 }
 0x122   : > { %1758 = vmatmul.mubr.bf16.gmra.mxu1 %v5086_v24 }
 0x123   : > { %1940 = vmatpush1.bf16.msra.mxu1 %v4285_v12  ;;  %1767 = vmatprep.mubr.bf16.mxu1 %v5095_v27  ;;  %v4343_v12 = vld [vmem:[%s4925_s11 + $0x68] sm:$0xff]  }
 0x124   : > { %1941 = vmatprep.subr.bf16.mxu1 %v4290_v14  ;;  %v4355_v14 = vld [vmem:[%s4925_s11 + $0xf8] sm:$0xff]  }
 0x127   : > { %1942 = vmatpush1.bf16.msra.mxu1 %v4288_v16  ;;  %v4344_v16 = vld [vmem:[%s4925_s11 + $0x28] sm:$0xff]  }
 0x128   : > { %1582 = vmatmul.mubr.bf16.gmra.mxu0 %v5200_v8  ;;  %1943 = vmatprep.subr.bf16.mxu1 %v4296_v19  ;;  %v4349_v19 = vld [vmem:[%s4925_s11 + $0x50] sm:$0xff]  }
 0x129   : > { %1850 = vmatprep.mubr.bf16.mxu0 %v4642_v3 }
 0x12a   : > { %1768 = vmatmul.mubr.bf16.gmra.mxu1 %v5113_v35 }
 0x12b   : > { %1944 = vmatpush1.bf16.msra.mxu1 %v4294_v21  ;;  %1777 = vmatprep.mubr.bf16.mxu1 %v5122_v39  ;;  %v4356_v21 = vld [vmem:[%s4925_s11 + $0xb8] sm:$0xff]  }
 0x12c   : > { %1945 = vmatprep.subr.bf16.mxu1 %v4299_v23  ;;  %v4352_v23 = vld [vmem:[%s4925_s11 + $0x8] sm:$0xff]  }
 0x12f   : > { %1946 = vmatpush1.bf16.msra.mxu1 %v4297_v26  ;;  %v4359_v26 = vld [vmem:[%s4925_s11 + $0xe8] sm:$0xff]  }
 0x130   : > { %1851 = vmatmul.mubr.bf16.vlgmr.msra.gmra.mxu0 %v4994_v43  ;;  %v4302_v43 = vld [vmem:[%s4911_s24 + $0x3d4] ss:$24 sps:$4 sm:$0xff]   ;;  %1947 = vmatprep.subr.bf16.mxu1 %v4305_v29 }
 0x131   : > { %2045 = vmatpush1.bf16.msra.mxu0 %v4273_v17  ;;  %1860 = vmatprep.mubr.bf16.mxu0 %v4642_v3  ;;  %v4345_v17 = vld [vmem:[%s4925_s11 + $0x60] sm:$0xff]   ;;  %v4360_v29 = vld [vmem:[%s4925_s11 + $0xa8] sm:$0xff]  }
 0x132   : > { %2046 = vmatprep.subr.bf16.mxu0 %v4284_v18  ;;  %1778 = vmatmul.mubr.bf16.gmra.mxu1 %v5144_v50  ;;  %v4348_v18 = vld [vmem:[%s4925_s11 + $0x18] sm:$0xff]  }
 0x133   : > { %1948 = vmatpush2.bf16.msra.mxu1 %v4303_v31  ;;  %1787 = vmatprep.mubr.bf16.mxu1 %v5150_v53  ;;  %v4363_v31 = vld [vmem:[%s4925_s11 + $0xd8] sm:$0xff]  }
 0x134   : > { %1949 = vmatprep.subr.bf16.mxu1 %v4308_v33  ;;  %v4365_v33 = vld [vmem:[%s4925_s11 + $0xd0] sm:$0xff]  }
 0x135   : > { %2047 = vmatpush1.bf16.msra.mxu0 %v4282_v22  ;;  %v4357_v22 = vld [vmem:[%s4925_s11 + $0xf0] sm:$0xff]  }
 0x136   : > { %2048 = vmatprep.subr.bf16.mxu0 %v4293_v25  ;;  %v4388_v25 = vld [vmem:[%s6067_s0 + $0x8] ss:$12 sps:$4 sm:$0xff]  }
 0x137   : > { %1950 = vmatpush2.bf16.msra.mxu1 %v4306_v34  ;;  %v4390_v34 = vld [vmem:[%s6067_s0 + $0x38] ss:$12 sps:$4 sm:$0xff]  }
 0x138   : > { %1861 = vmatmul.mubr.bf16.gmra.mxu0 %v5009_v52  ;;  %v4320_v52 = vld [vmem:[%s4911_s24 + $0x374] ss:$24 sps:$4 sm:$0xff]   ;;  %1951 = vmatprep.subr.bf16.mxu1 %v4314_v40 }
 0x139   : > { %1870 = vmatprep.mubr.bf16.mxu0 %v4642_v3  ;;  %2049 = vmatpush1.bf16.msra.mxu0 %v4291_v28  ;;  %v4354_v28 = vld [vmem:[%s4925_s11] sm:$0xff]  }
 0x13a   : > { %2050 = vmatprep.subr.bf16.mxu0 %v4302_v43  ;;  %1788 = vmatmul.mubr.bf16.gmra.mxu1 %v5167_v58  ;;  %v4361_v43 = vld [vmem:[%s4925_s11 + $0xe0] sm:$0xff]  }
 0x13b   : > { %1952 = vmatpush2.bf16.msra.mxu1 %v4312_v42  ;;  %1797 = vmatprep.mubr.bf16.mxu1 %v5173_v60  ;;  %v4370_v40 = vld [vmem:[%s4925_s11 + $0x80] sm:$0xff]  }
 0x13c   : > { %1953 = vmatprep.subr.bf16.mxu1 %v4317_v44 }
 0x13d   : > { %2051 = vmatpush1.bf16.msra.mxu0 %v4300_v32  ;;  %v4364_v32 = vld [vmem:[%s4925_s11 + $0x98] sm:$0xff]  }
 0x13e   : > { %2052 = vmatprep.subr.bf16.mxu0 %v4311_v36  ;;  %v4367_v36 = vld [vmem:[%s4925_s11 + $0xc8] sm:$0xff]  }
 0x13f   : > { %1954 = vmatpush2.bf16.msra.mxu1 %v4315_v47 }
 0x140   : > { %1871 = vmatmul.mubr.bf16.gmra.mxu0 %v5024_v61  ;;  %v4338_v61 = vld [vmem:[%s4911_s24 + $0x314] ss:$24 sps:$4 sm:$0xff]   ;;  %1955 = vmatprep.subr.bf16.mxu1 %v4323_v48 }
 0x141   : > { %1880 = vmatprep.mubr.bf16.mxu0 %v4642_v3  ;;  %2053 = vmatpush1.bf16.msra.mxu0 %v4309_v37  ;;  %v4369_v37 = vld [vmem:[%s4925_s11 + $0xc0] sm:$0xff]  }
 0x142   : > { %2054 = vmatprep.subr.bf16.mxu0 %v4320_v52  ;;  %1798 = vmatmul.mubr.bf16.gmra.mxu1 %v5185_v0  ;;  %v601_v52 = vlaneseq }
 0x143   : > { %1956 = vmatpush2.bf16.msra.mxu1 %v4321_v51  ;;  %1807 = vmatprep.mubr.bf16.mxu1 %v5191_v4 }
 0x144   : > { %1957 = vmatprep.subr.bf16.mxu1 %v4326_v55  ;;  %v5345_v44 = vshrl.u32 %v601_v52, 7 }
 0x145   : > { %2055 = vmatpush1.bf16.msra.mxu0 %v4318_v45 }
 0x146   : > { %2056 = vmatprep.subr.bf16.mxu0 %v4329_v46  ;;  %v607_v46 = vsub.s32 1, %v5345_v44  ;;  %v603_v47 = vsub.s32 0, %v5345_v44 }
 0x147   : > { %1958 = vmatpush2.bf16.msra.mxu1 %v4324_v57 }
 0x148   : > { %1881 = vmatmul.mubr.bf16.gmra.mxu0 %v5049_v9  ;;  %1959 = vmatprep.subr.bf16.mxu1 %v4332_v59 }
 0x149   : > { %1890 = vmatprep.mubr.bf16.mxu0 %v4642_v3  ;;  %2057 = vmatpush1.bf16.msra.mxu0 %v4327_v49 }
 0x14a   : > { %2058 = vmatprep.subr.bf16.mxu0 %v4338_v61  ;;  %1808 = vmatmul.mubr.bf16.gmra.mxu1 %v5200_v8 }
 0x14b   : > { %1960 = vmatpush2.bf16.msra.mxu1 %v4330_v62  ;;  %1963 = vmatprep.mubr.bf16.mxu1 %v4387_v2 }
 0x14c   : > { %1961 = vmatprep.subr.bf16.mxu1 %v4335_v38 }
 0x14d   : > { %2059 = vmatpush1.bf16.msra.mxu0 %v4336_v56 }
 0x14e   : > { %3797 = vmatprep.subr.bf16.mxu0 %v4355_v14 }
 0x14f   : > { %1962 = vmatpush2.bf16.msra.mxu1 %v4333_v63 }
 0x150   : > { %1891 = vmatmul.mubr.bf16.gmra.mxu0 %v5076_v20  ;;  %3733 = vmatprep.subr.bf16.mxu1 %v4339_v5 }
 0x151   : > { %1900 = vmatprep.mubr.bf16.mxu0 %v4642_v3 }
 0x152   : > { %1964 = vmatmul.mubr.bf16.vlgmr.msra.gmra.mxu1 %v5032_v1  ;;  %v4346_v1 = vld [vmem:[%s4925_s11 + $0x20] sm:$0xff]  }
 0x153   : > { %1973 = vmatprep.mubr.bf16.mxu1 %v5043_v7  ;;  %3734 = vmatpush3.bf16.msra.mxu1 %v4340_v6  ;;  %v4347_v7 = vld [vmem:[%s4925_s11 + $0x58] sm:$0xff]  }
 0x154   : > { %3735 = vmatprep.subr.bf16.mxu1 %v4341_v10 }
 0x157   : > { %3736 = vmatpush3.bf16.msra.mxu1 %v4342_v11 }
 0x158   : > { %1901 = vmatmul.mubr.bf16.gmra.mxu0 %v5102_v30  ;;  %3737 = vmatprep.subr.bf16.mxu1 %v4343_v12 }
 0x159   : > { %1910 = vmatprep.mubr.bf16.mxu0 %v4642_v3 }
 0x15a   : > { %1974 = vmatmul.mubr.bf16.gmra.mxu1 %v5059_v13  ;;  %v4350_v13 = vld [vmem:[%s4925_s11 + $0x10] sm:$0xff]  }
 0x15b   : > { %1983 = vmatprep.mubr.bf16.mxu1 %v5066_v15  ;;  %3738 = vmatpush3.bf16.msra.mxu1 %v4344_v16  ;;  %v4351_v15 = vld [vmem:[%s4925_s11 + $0x48] sm:$0xff]  }
 0x15c   : > { %3739 = vmatprep.subr.bf16.mxu1 %v4345_v17 }
 0x15f   : > { %3740 = vmatpush3.bf16.msra.mxu1 %v4346_v1 }
 0x160   : > { %1911 = vmatmul.mubr.bf16.gmra.mxu0 %v5128_v41  ;;  %3741 = vmatprep.subr.bf16.mxu1 %v4347_v7 }
 0x161   : > { %1920 = vmatprep.mubr.bf16.mxu0 %v4642_v3 }
 0x162   : > { %1984 = vmatmul.mubr.bf16.gmra.mxu1 %v5086_v24  ;;  %v4353_v24 = vld [vmem:[%s4925_s11 + $0x40] sm:$0xff]  }
 0x163   : > { %1993 = vmatprep.mubr.bf16.mxu1 %v5095_v27  ;;  %3742 = vmatpush3.bf16.msra.mxu1 %v4348_v18  ;;  %v4358_v27 = vld [vmem:[%s4925_s11 + $0xb0] sm:$0xff]  }
 0x164   : > { %3743 = vmatprep.subr.bf16.mxu1 %v4349_v19 }
 0x167   : > { %3744 = vmatpush3.bf16.msra.mxu1 %v4350_v13 }
 0x168   : > { %1921 = vmatmul.mubr.bf16.gmra.mxu0 %v5155_v54  ;;  %3745 = vmatprep.subr.bf16.mxu1 %v4351_v15 }
 0x169   : > { %2076 = vmatprep.mubr.bf16.mxu0 %v4642_v3 }
 0x16a   : > { %1994 = vmatmul.mubr.bf16.gmra.mxu1 %v5113_v35  ;;  %v4389_v35 = vld [vmem:[%s6067_s0 + $0x20] ss:$12 sps:$4 sm:$0xff]  }
 0x16b   : > { %2003 = vmatprep.mubr.bf16.mxu1 %v5122_v39  ;;  %3746 = vmatpush3.bf16.msra.mxu1 %v4352_v23  ;;  %v4362_v39 = vld [vmem:[%s4925_s11 + $0xa0] sm:$0xff]  }
 0x16c   : > { %3747 = vmatprep.subr.bf16.mxu1 %v4353_v24 }
 0x16f   : > { %3748 = vmatpush3.bf16.msra.mxu1 %v4354_v28 }
 0x170   : > { %2077 = vmatmul.mubr.bf16.vlgmr.msra.gmra.mxu0 %v4388_v25 }
 0x171   : > { %2086 = vmatprep.mubr.bf16.mxu0 %v4642_v3  ;;  %3798 = vmatpush3.bf16.msra.mxu0 %v4356_v21 }
 0x172   : > { %3799 = vmatprep.subr.bf16.mxu0 %v4357_v22  ;;  %2004 = vmatmul.mubr.bf16.gmra.mxu1 %v5144_v50  ;;  %v4366_v50 = vld [vmem:[%s4925_s11 + $0x90] sm:$0xff]  }
 0x173   : > { %2013 = vmatprep.mubr.bf16.mxu1 %v5150_v53  ;;  %v4368_v53 = vld [vmem:[%s4925_s11 + $0x88] sm:$0xff]  }
 0x175   : > { %3800 = vmatpush3.bf16.msra.mxu0 %v4358_v27 }
 0x176   : > { %3801 = vmatprep.subr.bf16.mxu0 %v4359_v26 }
 0x178   : > { %2087 = vmatmul.mubr.bf16.gmra.mxu0 %v4389_v35 }
 0x179   : > { %2096 = vmatprep.mubr.bf16.mxu0 %v4642_v3  ;;  %3802 = vmatpush3.bf16.msra.mxu0 %v4360_v29 }
 0x17a   : > { %3803 = vmatprep.subr.bf16.mxu0 %v4361_v43  ;;  %2014 = vmatmul.mubr.bf16.gmra.mxu1 %v5167_v58  ;;  %v4371_v58 = vld [vmem:[%s4925_s11 + $0x178] sm:$0xff]  }
 0x17b   : > { %2023 = vmatprep.mubr.bf16.mxu1 %v5173_v60  ;;  %3925 = vmatprep.subr.bf16.mxu1 %v4371_v58 }
 0x17d   : > { %3804 = vmatpush3.bf16.msra.mxu0 %v4362_v39 }
 0x17e   : > { %3805 = vmatprep.subr.bf16.mxu0 %v4363_v31  ;;  %v5389_v31 = vld [vmem:[%s4925_s11 + $0x138] sm:$0xff]  }
 0x180   : > { %2097 = vmatmul.mubr.bf16.gmra.mxu0 %v4390_v34 }
 0x181   : > { %2106 = vmatprep.mubr.bf16.mxu0 %v4642_v3  ;;  %3806 = vmatpush3.bf16.msra.mxu0 %v4364_v32 }
 0x182   : > { %3807 = vmatprep.subr.bf16.mxu0 %v4365_v33  ;;  %2024 = vmatmul.mubr.bf16.gmra.mxu1 %v5185_v0 }
 0x183   : > { %2033 = vmatprep.mubr.bf16.mxu1 %v5191_v4 }
 0x185   : > { %3808 = vmatpush3.bf16.msra.mxu0 %v4366_v50  ;;  %v5394_v50 = vld [vmem:[%s4925_s11 + $0x170] sm:$0xff]  }
 0x186   : > { %3809 = vmatprep.subr.bf16.mxu0 %v4367_v36 }
 0x188   : > { %2107 = vmatmul.mubr.bf16.gmra.mxu0 %v5049_v9 }
 0x189   : > { %2116 = vmatprep.mubr.bf16.mxu0 %v4642_v3  ;;  %3810 = vmatpush3.bf16.msra.mxu0 %v4368_v53 }
 0x18a   : > { %3811 = vmatprep.subr.bf16.mxu0 %v4369_v37  ;;  %2034 = vmatmul.mubr.bf16.gmra.mxu1 %v5200_v8 }
 0x18d   : > { %3812 = vmatpush3.bf16.msra.mxu0 %v4370_v40 }
 0x18e   : > { %3861 = vmatprep.subr.bf16.mxu0 %v4371_v58 }
 0x190   : > { %2117 = vmatmul.mubr.bf16.gmra.mxu0 %v5076_v20 }
 0x191   : > { %2126 = vmatprep.mubr.bf16.mxu0 %v4642_v3 }
 0x192   : > { %v1626_v9 = vpop.f32.mrf.mxu1 }
 0x194   : > { %v1628_v60 = vpop.f32.mrf.mxu1 }
 0x196   : > { %v1630_v0 = vpop.f32.mrf.mxu1 }
 0x198   : > { %2127 = vmatmul.mubr.bf16.gmra.mxu0 %v5102_v30  ;;  %v1632_v4 = vpop.f32.mrf.mxu1 }
 0x199   : > { %2136 = vmatprep.mubr.bf16.mxu0 %v4642_v3 }
 0x19a   : > { %v1636_v20 = vpop.f32.mrf.mxu1 }
 0x19c   : > { %v1638_v42 = vpop.f32.mrf.mxu1 }
 0x19e   : > { %v1640_v8 = vpop.f32.mrf.mxu1 }
 0x1a0   : > { %2137 = vmatmul.mubr.bf16.gmra.mxu0 %v5128_v41  ;;  %v1642_v30 = vpop.f32.mrf.mxu1  ;;  %v5354_v41 = vld [vmem:[%s4918_s14] sm:$0x3f]  ;;  %s6092_s14 = sld [smem:[#allocation19_spill]] }
 0x1a1   : > { %2146 = vmatprep.mubr.bf16.mxu0 %v4642_v3  ;;  %v5359_v49 = vrot.slane %v5354_v41, %v607_v46 }
 0x1a2   : > { %v5347_v45 = vpop.f32.mrf.mxu1 }
 0x1a4   : > { %v5351_v48 = vpop.f32.mrf.mxu1 }
 0x1a6   : > { %v5356_v3 = vpop.f32.mrf.mxu1  ;;  %p3646_p13 = scmp.ne.s32.totalorder %s6092_s14, 1 }
 0x1a8   : > { %2147 = vmatmul.mubr.bf16.gmra.mxu0 %v5155_v54  ;;  %v5362_v54 = vrot.slane %v5354_v41, %v603_v47  ;;  %v5364_v51 = vpop.f32.mrf.mxu1 }
 0x1aa   : > { %v5366_v56 = vpop.f32.mrf.mxu1 }
 0x1ac   : > { %v5370_v38 = vpop.f32.mrf.mxu1 }
 0x1ae   : > { %v5373_v5 = vpop.f32.mrf.mxu1 }
 0x1b0   : > { %v1513_v61 = vpop.f32.mrf.mxu0  ;;  %v5376_v16 = vpop.f32.mrf.mxu1 }
 0x1b1   : > { %v1514_v59 = vadd.f32 %v1513_v61, %v5362_v54 }
 0x1b2   : > { %v1515_v55 = vpop.f32.mrf.mxu0  ;;  %v5378_v18 = vpop.f32.mrf.mxu1 }
 0x1b3   : > { %v1516_v57 = vadd.f32 %v1515_v55, %v5359_v49  ;;  %v1627_v12 = vadd.f32 %v1626_v9, %v1514_v59 }
 0x1b4   : > { %v1517_v62 = vpop.f32.mrf.mxu0  ;;  %v5382_v25 = vpop.f32.mrf.mxu1 }
 0x1b5   : > { %v1518_v63 = vadd.f32 %v1517_v62, %v5362_v54  ;;  %v1629_v6 = vadd.f32 %v1628_v60, %v1516_v57  ;;  %v2157_v21 = vmax.f32 %v1627_v12, 0.0 }
 0x1b6   : > { %v1519_v2 = vpop.f32.mrf.mxu0  ;;  %v5385_v29 = vpop.f32.mrf.mxu1 }
 0x1b7   : > { %v1631_v10 = vadd.f32 %v1630_v0, %v1518_v63  ;;  %v1520_v11 = vadd.f32 %v1519_v2, %v5359_v49  ;;  %v2158_v19 = vmax.f32 %v1629_v6, 0.0  ;;  %v5402_v0 = vld [vmem:[%s4925_s11 + $0x130] sm:$0xff]   ;;  %v5419_v63 = vld [vmem:[%s4925_s11 + $0x128] sm:$0xff]  }
 0x1b8   : > { %v1523_v14 = vpop.f32.mrf.mxu0  ;;  %v5391_v34 = vpop.f32.mrf.mxu1 }
 0x1b9   : > { %v1633_v17 = vadd.f32 %v1632_v4, %v1520_v11  ;;  %v2163_v1 = vmax.f32 %v1631_v10, 0.0  ;;  %v1524_v22 = vadd.f32 %v1523_v14, %v5362_v54  ;;  %v5425_v11 = vld [vmem:[%s4925_s11 + $0x160] sm:$0xff]  }
 0x1ba   : > { %v1525_v7 = vpop.f32.mrf.mxu0  ;;  %v5397_v40 = vpop.f32.mrf.mxu1 }
 0x1bb   : > { %v2164_v13 = vmax.f32 %v1633_v17, 0.0  ;;  %v1526_v15 = vadd.f32 %v1525_v7, %v5359_v49  ;;  %v2269_v26 = vpack.c.bf16 %v2163_v1, %v2157_v21  ;;  %v1637_v32 = vadd.f32 %v1636_v20, %v1524_v22  ;;  %v5434_v7 = vld [vmem:[%s4925_s11 + $0x120] sm:$0xff]   ;;  %v5440_v21 = vld [vmem:[%s4925_s11 + $0x158] sm:$0xff]  }
 0x1bc   : > { %v1527_v23 = vpop.f32.mrf.mxu0 }
 0x1bd   : > { %v1528_v24 = vadd.f32 %v1527_v23, %v5362_v54  ;;  %v2270_v27 = vpack.c.bf16 %v2164_v13, %v2158_v19  ;;  %v1639_v43 = vadd.f32 %v1638_v42, %v1526_v15  ;;  %v2169_v4 = vmax.f32 %v1637_v32, 0.0  ;;  %v5405_v42 = vpop.f32.mrf.mxu1 }
 0x1be   : > { %v1529_v28 = vpop.f32.mrf.mxu0 }
 0x1bf   : > { %v1641_v35 = vadd.f32 %v1640_v8, %v1528_v24  ;;  %v1530_v39 = vadd.f32 %v1529_v28, %v5359_v49  ;;  %2733 = vmatprep.mubr.bf16.mxu1 %v2270_v27  ;;  %v2170_v58 = vmax.f32 %v1639_v43, 0.0  ;;  %v5408_v8 = vld [vmem:[%s4925_s11 + $0x168] sm:$0xff]   ;;  %v5412_v55 = vpop.f32.mrf.mxu1 }
 0x1c0   : > { %v1533_v33 = vpop.f32.mrf.mxu0  ;;  %2734 = vmatmul.mubr.bf16.vlgmr.msra.gmra.mxu1 %v2269_v26 }
 0x1c1   : > { %v1643_v36 = vadd.f32 %v1642_v30, %v1530_v39  ;;  %3933 = vmatpush3.bf16.msra.mxu1 %v5389_v31  ;;  %v2175_v53 = vmax.f32 %v1641_v35, 0.0  ;;  %v1534_v20 = vadd.f32 %v1533_v33, %v5362_v54  ;;  %v5422_v10 = vpop.f32.mrf.mxu1  ;;  %v5451_v39 = vld [vmem:[%s4925_s11 + $0x118] sm:$0xff]  }
 0x1c2   : > { %v1535_v37 = vpop.f32.mrf.mxu0  ;;  %3926 = vmatprep.subr.bf16.mxu1 %v5394_v50 }
 0x1c3   : > { %v2176_v9 = vmax.f32 %v1643_v36, 0.0  ;;  %v1536_v60 = vadd.f32 %v1535_v37, %v5359_v49  ;;  %v2275_v61 = vpack.c.bf16 %v2175_v53, %v2169_v4  ;;  %v1647_v2 = vadd.f32 %v5347_v45, %v1534_v20  ;;  %v5429_v14 = vpop.f32.mrf.mxu1  ;;  %v5457_v53 = vld [vmem:[%s4925_s11 + $0x150] sm:$0xff]  }
 0x1c4   : > { %v1537_v52 = vpop.f32.mrf.mxu0  ;;  %v5466_v4 = vld [vmem:[%s4925_s11 + $0x110] sm:$0xff]  }
 0x1c5   : > { %v1538_v30 = vadd.f32 %v1537_v52, %v5362_v54  ;;  %v2276_v46 = vpack.c.bf16 %v2176_v9, %v2170_v58  ;;  %3934 = vmatpush3.bf16.msra.mxu1 %v5402_v0  ;;  %v1649_v57 = vadd.f32 %v5351_v48, %v1536_v60  ;;  %v2181_v19 = vmax.f32 %v1647_v2, 0.0 }
 0x1c6   : > { %v1539_v47 = vpop.f32.mrf.mxu0  ;;  %3927 = vmatprep.subr.bf16.mxu1 %v5408_v8 }
 0x1c7   : > { %v1651_v59 = vadd.f32 %v5356_v3, %v1538_v30  ;;  %v1540_v62 = vadd.f32 %v1539_v47, %v5359_v49  ;;  %2741 = vmatprep.mubr.bf16.mxu1 %v2276_v46  ;;  %v2182_v17 = vmax.f32 %v1649_v57, 0.0  ;;  %v5472_v46 = vld [vmem:[%s4925_s11 + $0x148] sm:$0xff]  }
 0x1c8   : > { %v1543_v6 = vpop.f32.mrf.mxu0  ;;  %2742 = vmatmul.mubr.bf16.gmra.mxu1 %v2275_v61 }
 0x1c9   : > { %v1653_v12 = vadd.f32 %v5364_v51, %v1540_v62  ;;  %3935 = vmatpush3.bf16.msra.mxu1 %v5419_v63  ;;  %v2187_v48 = vmax.f32 %v1651_v59, 0.0  ;;  %v1544_v13 = vadd.f32 %v1543_v6, %v5362_v54  ;;  %v5437_v51 = vpop.f32.mrf.mxu1 }
 0x1ca   : > { %v1545_v3 = vpop.f32.mrf.mxu0  ;;  %3928 = vmatprep.subr.bf16.mxu1 %v5425_v11 }
 0x1cb   : > { %v2188_v1 = vmax.f32 %v1653_v12, 0.0  ;;  %v1546_v45 = vadd.f32 %v1545_v3, %v5359_v49  ;;  %v2281_v27 = vpack.c.bf16 %v2187_v48, %v2181_v19  ;;  %v5444_v26 = vpop.f32.mrf.mxu1  ;;  %v1657_v32 = vadd.f32 %v5366_v56, %v1544_v13  ;;  %v5483_v48 = vld [vmem:[%s4925_s11 + $0x108] sm:$0xff]  }
 0x1cc   : > { %v1547_v15 = vpop.f32.mrf.mxu0 }
 0x1cd   : > { %v1548_v22 = vadd.f32 %v1547_v15, %v5362_v54  ;;  %v2282_v23 = vpack.c.bf16 %v2188_v1, %v2182_v17  ;;  %3936 = vmatpush3.bf16.msra.mxu1 %v5434_v7  ;;  %v1659_v28 = vadd.f32 %v5370_v38, %v1546_v45  ;;  %v5454_v36 = vpop.f32.mrf.mxu1  ;;  %v2193_v20 = vmax.f32 %v1657_v32, 0.0  ;;  %v5489_v45 = vld [vmem:[%s4925_s11 + $0x140] sm:$0xff]  }
 0x1ce   : > { %v1549_v24 = vpop.f32.mrf.mxu0  ;;  %3929 = vmatprep.subr.bf16.mxu1 %v5440_v21 }
 0x1cf   : > { %v1661_v43 = vadd.f32 %v5373_v5, %v1548_v22  ;;  %v1550_v35 = vadd.f32 %v1549_v24, %v5359_v49  ;;  %2749 = vmatprep.mubr.bf16.mxu1 %v2282_v23  ;;  %v5461_v58 = vpop.f32.mrf.mxu1  ;;  %v2194_v9 = vmax.f32 %v1659_v28, 0.0  ;;  %v5498_v23 = vld [vmem:[%s4925_s11 + $0x100] sm:$0xff]  }
 0x1d0   : > { %v1553_v33 = vpop.f32.mrf.mxu0  ;;  %2750 = vmatmul.mubr.bf16.gmra.mxu1 %v2281_v27 }
 0x1d1   : > { %v1663_v37 = vadd.f32 %v5376_v16, %v1550_v35  ;;  %3937 = vmatpush3.bf16.msra.mxu1 %v5451_v39  ;;  %v2199_v38 = vmax.f32 %v1661_v43, 0.0  ;;  %v1554_v52 = vadd.f32 %v1553_v33, %v5362_v54  ;;  %v5469_v16 = vpop.f32.mrf.mxu1 }
 0x1d2   : > { %v1555_v5 = vpop.f32.mrf.mxu0  ;;  %3930 = vmatprep.subr.bf16.mxu1 %v5457_v53 }
 0x1d3   : > { %v2200_v60 = vmax.f32 %v1663_v37, 0.0  ;;  %v1556_v56 = vadd.f32 %v1555_v5, %v5359_v49  ;;  %v2287_v59 = vpack.c.bf16 %v2199_v38, %v2193_v20  ;;  %v5476_v62 = vpop.f32.mrf.mxu1  ;;  %v1667_v3 = vadd.f32 %v5378_v18, %v1554_v52 }
 0x1d4   : > { %v1557_v30 = vpop.f32.mrf.mxu0 }
 0x1d5   : > { %v1558_v47 = vadd.f32 %v1557_v30, %v5362_v54  ;;  %v2288_v61 = vpack.c.bf16 %v2200_v60, %v2194_v9  ;;  %3938 = vmatpush3.bf16.msra.mxu1 %v5466_v4  ;;  %v1669_v2 = vadd.f32 %v5382_v25, %v1556_v56  ;;  %v5486_v1 = vpop.f32.mrf.mxu1  ;;  %v2205_v24 = vmax.f32 %v1667_v3, 0.0 }
 0x1d6   : > { %v1559_v57 = vpop.f32.mrf.mxu0  ;;  %3931 = vmatprep.subr.bf16.mxu1 %v5472_v46 }
 0x1d7   : > { %v1671_v6 = vadd.f32 %v5385_v29, %v1558_v47  ;;  %v1560_v12 = vadd.f32 %v1559_v57, %v5359_v49  ;;  %2757 = vmatprep.mubr.bf16.mxu1 %v2288_v61  ;;  %v5493_v13 = vpop.f32.mrf.mxu1  ;;  %v2206_v15 = vmax.f32 %v1669_v2, 0.0 }
 0x1d8   : > { %v1563_v17 = vpop.f32.mrf.mxu0  ;;  %2758 = vmatmul.mubr.bf16.gmra.mxu1 %v2287_v59 }
 0x1d9   : > { %v1673_v19 = vadd.f32 %v5391_v34, %v1560_v12  ;;  %3939 = vmatpush3.bf16.msra.mxu1 %v5483_v48  ;;  %v2211_v25 = vmax.f32 %v1671_v6, 0.0  ;;  %v1564_v27 = vadd.f32 %v1563_v17, %v5362_v54  ;;  %v5501_v43 = vpop.f32.mrf.mxu1 }
 0x1da   : > { %v1565_v29 = vpop.f32.mrf.mxu0  ;;  %3932 = vmatprep.subr.bf16.mxu1 %v5489_v45 }
 0x1db   : > { %v2212_v22 = vmax.f32 %v1673_v19, 0.0  ;;  %v1566_v18 = vadd.f32 %v1565_v29, %v5359_v49  ;;  %v2293_v32 = vpack.c.bf16 %v2211_v25, %v2205_v24  ;;  %v5505_v37 = vpop.f32.mrf.mxu1  ;;  %v1677_v60 = vadd.f32 %v5397_v40, %v1564_v27 }
 0x1dc   : > { %v1567_v28 = vpop.f32.mrf.mxu0 }
 0x1dd   : > { %v1568_v34 = vadd.f32 %v1567_v28, %v5362_v54  ;;  %v2294_v35 = vpack.c.bf16 %v2212_v22, %v2206_v15  ;;  %3940 = vmatpush3.bf16.msra.mxu1 %v5498_v23  ;;  %v1679_v38 = vadd.f32 %v5405_v42, %v1566_v18  ;;  %v5511_v20 = vpop.f32.mrf.mxu1 }
 0x1de   : > { %v1569_v33 = vpop.f32.mrf.mxu0 }
 0x1df   : > { %v1681_v5 = vadd.f32 %v5412_v55, %v1568_v34  ;;  %v1570_v9 = vadd.f32 %v1569_v33, %v5359_v49  ;;  %2765 = vmatprep.mubr.bf16.mxu1 %v2294_v35  ;;  %v5514_v61 = vpop.f32.mrf.mxu1  ;;  %v2218_v57 = vmax.f32 %v1679_v38, 0.0  ;;  %v2217_v55 = vmax.f32 %v1677_v60, 0.0 }
 0x1e0   : > { %v1573_v56 = vpop.f32.mrf.mxu0  ;;  %2766 = vmatmul.mubr.bf16.gmra.mxu1 %v2293_v32  ;;  %v611_v34 = vsub.s32 2, %v5345_v44  ;;  %v615_v38 = vsub.s32 3, %v5345_v44 }
 0x1e1   : > { %v1683_v52 = vadd.f32 %v5422_v10, %v1570_v9  ;;  %v2223_v30 = vmax.f32 %v1681_v5, 0.0  ;;  %v1574_v2 = vadd.f32 %v1573_v56, %v5362_v54  ;;  %v5518_v12 = vpop.f32.mrf.mxu1 }
 0x1e2   : > { %v1575_v47 = vpop.f32.mrf.mxu0 }
 0x1e3   : > { %v2224_v59 = vmax.f32 %v1683_v52, 0.0  ;;  %v1576_v42 = vadd.f32 %v1575_v47, %v5359_v49  ;;  %v2299_v17 = vpack.c.bf16 %v2223_v30, %v2217_v55  ;;  %v5521_v10 = vpop.f32.mrf.mxu1  ;;  %v1687_v22 = vadd.f32 %v5429_v14, %v1574_v2 }
 0x1e4   : > { %v1577_v6 = vpop.f32.mrf.mxu0  ;;  %v5540_v30 = vrot.slane %v5354_v41, %v611_v34 }
 0x1e5   : > { %v1578_v40 = vadd.f32 %v1577_v6, %v5362_v54  ;;  %v2300_v3 = vpack.c.bf16 %v2224_v59, %v2218_v57  ;;  %v1689_v25 = vadd.f32 %v5437_v51, %v1576_v42  ;;  %v5527_v24 = vpop.f32.mrf.mxu1  ;;  %v2229_v5 = vmax.f32 %v1687_v22, 0.0 }
 0x1e6   : > { %v1579_v19 = vpop.f32.mrf.mxu0  ;;  %v5546_v42 = vrot.slane %v5354_v41, %v615_v38 }
 0x1e7   : > { %v1691_v29 = vadd.f32 %v5444_v26, %v1578_v40  ;;  %v1580_v15 = vadd.f32 %v1579_v19, %v5359_v49  ;;  %2773 = vmatprep.mubr.bf16.mxu1 %v2300_v3  ;;  %v5531_v32 = vpop.f32.mrf.mxu1  ;;  %v2230_v51 = vmax.f32 %v1689_v25, 0.0 }
 0x1e8   : > { %v1583_v18 = vpop.f32.mrf.mxu0  ;;  %2774 = vmatmul.mubr.bf16.gmra.mxu1 %v2299_v17  ;;  %v1740_v17 = vadd.f32 %v5493_v13, %v5540_v30 }
 0x1e9   : > { %v1693_v27 = vadd.f32 %v5454_v36, %v1580_v15  ;;  %v2235_v28 = vmax.f32 %v1691_v29, 0.0  ;;  %v1584_v14 = vadd.f32 %v1583_v18, %v5362_v54  ;;  %v5536_v60 = vpop.f32.mrf.mxu1 }
 0x1ea   : > { %v1585_v35 = vpop.f32.mrf.mxu0 }
 0x1eb   : > { %v2236_v33 = vmax.f32 %v1693_v27, 0.0  ;;  %v1586_v26 = vadd.f32 %v1585_v35, %v5359_v49  ;;  %v2305_v52 = vpack.c.bf16 %v2235_v28, %v2229_v5  ;;  %v5542_v57 = vpop.f32.mrf.mxu1 }
 0x1ec   : > { %v1587_v9 = vpop.f32.mrf.mxu0 }
 0x1ed   : > { %v1588_v36 = vadd.f32 %v1587_v9, %v5362_v54  ;;  %v2306_v56 = vpack.c.bf16 %v2236_v33, %v2230_v51  ;;  %v1699_v59 = vadd.f32 %v5469_v16, %v1586_v26  ;;  %v1697_v54 = vadd.f32 %v5461_v58, %v1584_v14  ;;  %v5551_v40 = vpop.f32.mrf.mxu1 }
 0x1ee   : > { %v1589_v47 = vpop.f32.mrf.mxu0  ;;  %v1744_v58 = vadd.f32 %v5505_v37, %v5540_v30 }
 0x1ef   : > { %v1701_v55 = vadd.f32 %v5476_v62, %v1588_v36  ;;  %v1590_v2 = vadd.f32 %v1589_v47, %v5359_v49  ;;  %2781 = vmatprep.mubr.bf16.mxu1 %v2306_v56  ;;  %v5556_v25 = vpop.f32.mrf.mxu1  ;;  %v2242_v29 = vmax.f32 %v1699_v59, 0.0  ;;  %v1742_v49 = vadd.f32 %v5501_v43, %v5546_v42 }
 0x1f0   : > { %v1852_v6 = vpop.f32.mrf.mxu0  ;;  %2782 = vmatmul.mubr.bf16.gmra.mxu1 %v2305_v52  ;;  %v2241_v15 = vmax.f32 %v1697_v54, 0.0  ;;  %v1752_v52 = vadd.f32 %v5518_v12, %v5546_v42  ;;  %v1754_v47 = vadd.f32 %v5521_v10, %v5540_v30 }
 0x1f1   : > { %v1703_v3 = vadd.f32 %v5486_v1, %v1590_v2  ;;  %v2247_v16 = vmax.f32 %v1701_v55, 0.0  ;;  %v5562_v18 = vpop.f32.mrf.mxu1  ;;  %v1746_v1 = vadd.f32 %v5511_v20, %v5546_v42  ;;  %v1853_v35 = vadd.f32 %v1852_v6, %v1740_v17 }
 0x1f2   : > { %v1854_v19 = vpop.f32.mrf.mxu0  ;;  %v1750_v20 = vadd.f32 %v5514_v61, %v5540_v30  ;;  %v1756_v6 = vadd.f32 %v5527_v24, %v5546_v42 }
 0x1f3   : > { %v2248_v62 = vmax.f32 %v1703_v3, 0.0  ;;  %v1855_v13 = vadd.f32 %v1854_v19, %v1742_v49  ;;  %v2311_v34 = vpack.c.bf16 %v2247_v16, %v2241_v15  ;;  %v5566_v33 = vpop.f32.mrf.mxu1  ;;  %v2159_v9 = vmax.f32 %v1853_v35, 0.0 }
 0x1f4   : > { %v1856_v22 = vpop.f32.mrf.mxu0  ;;  %v1760_v15 = vadd.f32 %v5531_v32, %v5540_v30  ;;  %v1766_v32 = vadd.f32 %v5551_v40, %v5546_v42 }
 0x1f5   : > { %v1857_v27 = vadd.f32 %v1856_v22, %v1744_v58  ;;  %v2312_v28 = vpack.c.bf16 %v2248_v62, %v2242_v29  ;;  %v5568_v38 = vpop.f32.mrf.mxu1  ;;  %v2160_v5 = vmax.f32 %v1855_v13, 0.0  ;;  %v1762_v13 = vadd.f32 %v5536_v60, %v5546_v42 }
 0x1f6   : > { %v1858_v51 = vpop.f32.mrf.mxu0 }
 0x1f7   : > { %v1859_v43 = vadd.f32 %v1858_v51, %v1746_v1  ;;  %2789 = vmatprep.mubr.bf16.mxu1 %v2312_v28  ;;  %v2165_v26 = vmax.f32 %v1857_v27, 0.0  ;;  %v5572_v56 = vpop.f32.mrf.mxu1 }
 0x1f8   : > { %v1862_v37 = vpop.f32.mrf.mxu0  ;;  %2790 = vmatmul.mubr.bf16.gmra.mxu1 %v2311_v34 }
 0x1f9   : > { %v2166_v14 = vmax.f32 %v1859_v43, 0.0  ;;  %v2271_v55 = vpack.c.bf16 %v2165_v26, %v2159_v9  ;;  %v5578_v54 = vpop.f32.mrf.mxu1  ;;  %v1863_v61 = vadd.f32 %v1862_v37, %v1750_v20  ;;  %v1770_v9 = vadd.f32 %v5556_v25, %v5540_v30 }
 0x1fa   : > { %v1864_v36 = vpop.f32.mrf.mxu0  ;;  %v1776_v25 = vadd.f32 %v5568_v38, %v5546_v42 }
 0x1fb   : > { %v2272_v59 = vpack.c.bf16 %v2166_v14, %v2160_v5  ;;  %v1865_v3 = vadd.f32 %v1864_v36, %v1752_v52  ;;  %v5582_v19 = vpop.f32.mrf.mxu1  ;;  %v2171_v24 = vmax.f32 %v1863_v61, 0.0  ;;  %v1772_v52 = vadd.f32 %v5562_v18, %v5546_v42 }
 0x1fc   : > { %v1866_v2 = vpop.f32.mrf.mxu0 }
 0x1fd   : > { %v1867_v17 = vadd.f32 %v1866_v2, %v1754_v47  ;;  %2830 = vmatprep.mubr.bf16.mxu0 %v2272_v59  ;;  %v5585_v49 = vpop.f32.mrf.mxu1  ;;  %v2172_v58 = vmax.f32 %v1865_v3, 0.0 }
 0x1fe   : > { %v1868_v16 = vpop.f32.mrf.mxu0  ;;  %2831 = vmatmul.mubr.bf16.vlgmr.msra.gmra.mxu0 %v2271_v55 }
 0x1ff   : > { %v1869_v12 = vadd.f32 %v1868_v16, %v1756_v6  ;;  %3862 = vmatpush3.bf16.msra.mxu0 %v5389_v31  ;;  %v2177_v10 = vmax.f32 %v1867_v17, 0.0  ;;  %v5590_v1 = vpop.f32.mrf.mxu1  ;;  %v1764_v31 = vadd.f32 %v5542_v57, %v5540_v30 }
 0x200   : > { %v1872_v29 = vpop.f32.mrf.mxu0  ;;  %3863 = vmatprep.subr.bf16.mxu0 %v5394_v50 }
 0x201   : > { %v2178_v62 = vmax.f32 %v1869_v12, 0.0  ;;  %v2277_v28 = vpack.c.bf16 %v2177_v10, %v2171_v24  ;;  %v5597_v34 = vpop.f32.mrf.mxu1  ;;  %v1873_v43 = vadd.f32 %v1872_v29, %v1760_v15  ;;  %v1780_v10 = vadd.f32 %v5572_v56, %v5540_v30 }
 0x202   : > { %v1874_v22 = vpop.f32.mrf.mxu0  ;;  %v1786_v56 = vadd.f32 %v5585_v49, %v5546_v42 }
 0x203   : > { %v2278_v27 = vpack.c.bf16 %v2178_v62, %v2172_v58  ;;  %3864 = vmatpush3.bf16.msra.mxu0 %v5402_v0  ;;  %v1875_v35 = vadd.f32 %v1874_v22, %v1762_v13  ;;  %v5602_v26 = vpop.f32.mrf.mxu1  ;;  %v2183_v40 = vmax.f32 %v1873_v43, 0.0  ;;  %v1782_v62 = vadd.f32 %v5578_v54, %v5546_v42 }
 0x204   : > { %v1876_v50 = vpop.f32.mrf.mxu0  ;;  %3865 = vmatprep.subr.bf16.mxu0 %v5408_v8 }
 0x205   : > { %v1877_v51 = vadd.f32 %v1876_v50, %v1764_v31  ;;  %2838 = vmatprep.mubr.bf16.mxu0 %v2278_v27  ;;  %v5605_v5 = vpop.f32.mrf.mxu1  ;;  %v2184_v8 = vmax.f32 %v1875_v35, 0.0 }
 0x206   : > { %v1878_v60 = vpop.f32.mrf.mxu0  ;;  %2839 = vmatmul.mubr.bf16.gmra.mxu0 %v2277_v28 }
 0x207   : > { %v1879_v57 = vadd.f32 %v1878_v60, %v1766_v32  ;;  %3866 = vmatpush3.bf16.msra.mxu0 %v5419_v63  ;;  %v2189_v0 = vmax.f32 %v1877_v51, 0.0  ;;  %v5610_v36 = vpop.f32.mrf.mxu1  ;;  %v1774_v63 = vadd.f32 %v5566_v33, %v5540_v30  ;;  %v1790_v51 = vadd.f32 %v5590_v1, %v5540_v30 }
 0x208   : > { %v1882_v37 = vpop.f32.mrf.mxu0  ;;  %3867 = vmatprep.subr.bf16.mxu0 %v5425_v11 }
 0x209   : > { %v2190_v14 = vmax.f32 %v1879_v57, 0.0  ;;  %v2283_v59 = vpack.c.bf16 %v2189_v0, %v2183_v40  ;;  %v5617_v55 = vpop.f32.mrf.mxu1  ;;  %v1883_v3 = vadd.f32 %v1882_v37, %v1770_v9  ;;  %v1792_v57 = vadd.f32 %v5597_v34, %v5546_v42 }
 0x20a   : > { %v1884_v20 = vpop.f32.mrf.mxu0 }
 0x20b   : > { %v2284_v47 = vpack.c.bf16 %v2190_v14, %v2184_v8  ;;  %3868 = vmatpush3.bf16.msra.mxu0 %v5434_v7  ;;  %v1885_v2 = vadd.f32 %v1884_v20, %v1772_v52  ;;  %v5622_v17 = vpop.f32.mrf.mxu1  ;;  %v2195_v38 = vmax.f32 %v1883_v3, 0.0  ;;  %v1796_v14 = vadd.f32 %v5605_v5, %v5546_v42 }
 0x20c   : > { %v1886_v11 = vpop.f32.mrf.mxu0  ;;  %3869 = vmatprep.subr.bf16.mxu0 %v5440_v21  ;;  %v1804_v3 = vadd.f32 %v5622_v17, %v5540_v30 }
 0x20d   : > { %v1887_v6 = vadd.f32 %v1886_v11, %v1774_v63  ;;  %2846 = vmatprep.mubr.bf16.mxu0 %v2284_v47  ;;  %v5625_v16 = vpop.f32.mrf.mxu1  ;;  %v2196_v21 = vmax.f32 %v1885_v2, 0.0 }
 0x20e   : > { %v1888_v18 = vpop.f32.mrf.mxu0  ;;  %2847 = vmatmul.mubr.bf16.gmra.mxu0 %v2283_v59 }
 0x20f   : > { %v1889_v33 = vadd.f32 %v1888_v18, %v1776_v25  ;;  %3870 = vmatpush3.bf16.msra.mxu0 %v5451_v39  ;;  %v2201_v7 = vmax.f32 %v1887_v6, 0.0  ;;  %v5630_v58 = vpop.f32.mrf.mxu1  ;;  %v1784_v39 = vadd.f32 %v5582_v19, %v5540_v30  ;;  %v1800_v25 = vadd.f32 %v5610_v36, %v5540_v30 }
 0x210   : > { %v1892_v61 = vpop.f32.mrf.mxu0  ;;  %3871 = vmatprep.subr.bf16.mxu0 %v5457_v53  ;;  %v1802_v6 = vadd.f32 %v5617_v55, %v5546_v42 }
 0x211   : > { %v2202_v12 = vmax.f32 %v1889_v33, 0.0  ;;  %v2289_v15 = vpack.c.bf16 %v2201_v7, %v2195_v38  ;;  %v5637_v22 = vpop.f32.mrf.mxu1  ;;  %v1893_v27 = vadd.f32 %v1892_v61, %v1780_v10 }
 0x212   : > { %v1894_v29 = vpop.f32.mrf.mxu0 }
 0x213   : > { %v2290_v24 = vpack.c.bf16 %v2202_v12, %v2196_v21  ;;  %3872 = vmatpush3.bf16.msra.mxu0 %v5466_v4  ;;  %v1895_v13 = vadd.f32 %v1894_v29, %v1782_v62  ;;  %v5642_v28 = vpop.f32.mrf.mxu1  ;;  %v2207_v49 = vmax.f32 %v1893_v27, 0.0  ;;  %v1806_v21 = vadd.f32 %v5625_v16, %v5546_v42 }
 0x214   : > { %v1896_v53 = vpop.f32.mrf.mxu0  ;;  %3873 = vmatprep.subr.bf16.mxu0 %v5472_v46  ;;  %v619_v16 = vsub.s32 4, %v5345_v44  ;;  %v1812_v27 = vadd.f32 %v5637_v22, %v5546_v42 }
 0x215   : > { %v1897_v31 = vadd.f32 %v1896_v53, %v1784_v39  ;;  %2854 = vmatprep.mubr.bf16.mxu0 %v2290_v24  ;;  %v5645_v32 = vpop.f32.mrf.mxu1  ;;  %v2208_v46 = vmax.f32 %v1895_v13, 0.0 }
 0x216   : > { %v1898_v54 = vpop.f32.mrf.mxu0  ;;  %2855 = vmatmul.mubr.bf16.gmra.mxu0 %v2289_v15 }
 0x217   : > { %v1899_v19 = vadd.f32 %v1898_v54, %v1786_v56  ;;  %3874 = vmatpush3.bf16.msra.mxu0 %v5483_v48  ;;  %v2213_v4 = vmax.f32 %v1897_v31, 0.0  ;;  %v5650_v60 = vpop.f32.mrf.mxu1  ;;  %v1794_v48 = vadd.f32 %v5602_v26, %v5540_v30  ;;  %v1810_v56 = vadd.f32 %v5630_v58, %v5540_v30 }
 0x218   : > { %v1902_v50 = vpop.f32.mrf.mxu0  ;;  %3875 = vmatprep.subr.bf16.mxu0 %v5489_v45  ;;  %v1814_v54 = vadd.f32 %v5642_v28, %v5540_v30  ;;  %v1816_v58 = vadd.f32 %v5645_v32, %v5546_v42 }
 0x219   : > { %v2214_v35 = vmax.f32 %v1899_v19, 0.0  ;;  %v2295_v37 = vpack.c.bf16 %v2213_v4, %v2207_v49  ;;  %v5657_v8 = vpop.f32.mrf.mxu1  ;;  %v1903_v9 = vadd.f32 %v1902_v50, %v1790_v51  ;;  %v623_v4 = vsub.s32 5, %v5345_v44 }
 0x21a   : > { %v1904_v43 = vpop.f32.mrf.mxu0 }
 0x21b   : > { %v2296_v0 = vpack.c.bf16 %v2214_v35, %v2208_v46  ;;  %3876 = vmatpush3.bf16.msra.mxu0 %v5498_v23  ;;  %v1905_v1 = vadd.f32 %v1904_v43, %v1792_v57  ;;  %v5661_v34 = vpop.f32.mrf.mxu1  ;;  %v2219_v11 = vmax.f32 %v1903_v9, 0.0  ;;  %v5696_v57 = vrot.slane %v5354_v41, %v619_v16 }
 0x21c   : > { %v1906_v45 = vpop.f32.mrf.mxu0  ;;  %v5699_v28 = vrot.slane %v5354_v41, %v623_v4 }
 0x21d   : > { %v1907_v40 = vadd.f32 %v1906_v45, %v1794_v48  ;;  %2862 = vmatprep.mubr.bf16.mxu0 %v2296_v0  ;;  %v5663_v47 = vpop.f32.mrf.mxu1  ;;  %v2220_v23 = vmax.f32 %v1905_v1, 0.0  ;;  %v1966_v32 = vadd.f32 %v5650_v60, %v5696_v57  ;;  %v1970_v41 = vadd.f32 %v5661_v34, %v5696_v57 }
 0x21e   : > { %v1908_v20 = vpop.f32.mrf.mxu0  ;;  %2863 = vmatmul.mubr.bf16.gmra.mxu0 %v2295_v37  ;;  %v1968_v9 = vadd.f32 %v5657_v8, %v5699_v28 }
 0x21f   : > { %v1909_v52 = vadd.f32 %v1908_v20, %v1796_v14  ;;  %v2225_v26 = vmax.f32 %v1907_v40, 0.0  ;;  %v5667_v2 = vpop.f32.mrf.mxu1 }
 0x220   : > { %v1912_v63 = vpop.f32.mrf.mxu0 }
 0x221   : > { %v2226_v59 = vmax.f32 %v1909_v52, 0.0  ;;  %v2301_v33 = vpack.c.bf16 %v2225_v26, %v2219_v11  ;;  %v5673_v61 = vpop.f32.mrf.mxu1  ;;  %v1913_v36 = vadd.f32 %v1912_v63, %v1800_v25 }
 0x222   : > { %v1914_v5 = vpop.f32.mrf.mxu0 }
 0x223   : > { %v2302_v18 = vpack.c.bf16 %v2226_v59, %v2220_v23  ;;  %v1915_v12 = vadd.f32 %v1914_v5, %v1802_v6  ;;  %v5677_v29 = vpop.f32.mrf.mxu1  ;;  %v2231_v53 = vmax.f32 %v1913_v36, 0.0  ;;  %v1972_v23 = vadd.f32 %v5663_v47, %v5699_v28 }
 0x224   : > { %v1916_v7 = vpop.f32.mrf.mxu0  ;;  %v1978_v47 = vadd.f32 %v5673_v61, %v5699_v28  ;;  %v1980_v36 = vadd.f32 %v5677_v29, %v5696_v57 }
 0x225   : > { %v1917_v38 = vadd.f32 %v1916_v7, %v1804_v3  ;;  %2870 = vmatprep.mubr.bf16.mxu0 %v2302_v18  ;;  %v5679_v17 = vpop.f32.mrf.mxu1  ;;  %v2232_v24 = vmax.f32 %v1915_v12, 0.0 }
 0x226   : > { %v1918_v10 = vpop.f32.mrf.mxu0  ;;  %2871 = vmatmul.mubr.bf16.gmra.mxu0 %v2301_v33 }
 0x227   : > { %v1919_v55 = vadd.f32 %v1918_v10, %v1806_v21  ;;  %v2237_v62 = vmax.f32 %v1917_v38, 0.0  ;;  %v5684_v31 = vpop.f32.mrf.mxu1  ;;  %v1976_v21 = vadd.f32 %v5667_v2, %v5696_v57 }
 0x228   : > { %v1922_v39 = vpop.f32.mrf.mxu0 }
 0x229   : > { %v2238_v15 = vmax.f32 %v1919_v55, 0.0  ;;  %v2307_v50 = vpack.c.bf16 %v2237_v62, %v2231_v53  ;;  %v5691_v35 = vpop.f32.mrf.mxu1  ;;  %v1923_v43 = vadd.f32 %v1922_v39, %v1810_v56 }
 0x22a   : > { %v1924_v13 = vpop.f32.mrf.mxu0 }
 0x22b   : > { %v2308_v19 = vpack.c.bf16 %v2238_v15, %v2232_v24  ;;  %v1925_v49 = vadd.f32 %v1924_v13, %v1812_v27  ;;  %v1989_v30 = vpop.f32.mrf.mxu1  ;;  %v2243_v42 = vmax.f32 %v1923_v43, 0.0  ;;  %v1982_v24 = vadd.f32 %v5679_v17, %v5699_v28 }
 0x22c   : > { %v1926_v46 = vpop.f32.mrf.mxu0  ;;  %v1988_v17 = vadd.f32 %v5691_v35, %v5699_v28 }
 0x22d   : > { %v1927_v51 = vadd.f32 %v1926_v46, %v1814_v54  ;;  %2878 = vmatprep.mubr.bf16.mxu0 %v2308_v19  ;;  %v1991_v37 = vpop.f32.mrf.mxu1  ;;  %v2244_v45 = vmax.f32 %v1925_v49, 0.0  ;;  %v1990_v49 = vadd.f32 %v1989_v30, %v5696_v57 }
 0x22e   : > { %v1928_v22 = vpop.f32.mrf.mxu0  ;;  %2879 = vmatmul.mubr.bf16.gmra.mxu0 %v2307_v50  ;;  %v1986_v50 = vadd.f32 %v5684_v31, %v5696_v57 }
 0x22f   : > { %v1929_v44 = vadd.f32 %v1928_v22, %v1816_v58  ;;  %v2249_v48 = vmax.f32 %v1927_v51, 0.0  ;;  %v5703_v40 = vpop.f32.mrf.mxu1 }
 0x230   : > { %v2078_v0 = vpop.f32.mrf.mxu0  ;;  %v1996_v30 = vadd.f32 %v5703_v40, %v5696_v57 }
 0x231   : > { %v2250_v14 = vmax.f32 %v1929_v44, 0.0  ;;  %v2313_v52 = vpack.c.bf16 %v2249_v48, %v2243_v42  ;;  %v5709_v63 = vpop.f32.mrf.mxu1  ;;  %v2079_v60 = vadd.f32 %v2078_v0, %v1966_v32  ;;  %v1992_v48 = vadd.f32 %v1991_v37, %v5699_v28 }
 0x232   : > { %v2080_v1 = vpop.f32.mrf.mxu0  ;;  %v1998_v37 = vadd.f32 %v5709_v63, %v5699_v28 }
 0x233   : > { %v2314_v20 = vpack.c.bf16 %v2250_v14, %v2244_v45  ;;  %v2081_v59 = vadd.f32 %v2080_v1, %v1968_v9  ;;  %v1999_v5 = vpop.f32.mrf.mxu1  ;;  %v2161_v7 = vmax.f32 %v2079_v60, 0.0 }
 0x234   : > { %v2082_v26 = vpop.f32.mrf.mxu0 }
 0x235   : > { %v2083_v11 = vadd.f32 %v2082_v26, %v1970_v41  ;;  %2886 = vmatprep.mubr.bf16.mxu0 %v2314_v20  ;;  %v2001_v18 = vpop.f32.mrf.mxu1  ;;  %v2162_v34 = vmax.f32 %v2081_v59, 0.0 }
 0x236   : > { %v2084_v25 = vpop.f32.mrf.mxu0  ;;  %2887 = vmatmul.mubr.bf16.gmra.mxu0 %v2313_v52 }
 0x237   : > { %v2085_v6 = vadd.f32 %v2084_v25, %v1972_v23  ;;  %v2167_v8 = vmax.f32 %v2083_v11, 0.0  ;;  %v5715_v38 = vpop.f32.mrf.mxu1  ;;  %v2000_v23 = vadd.f32 %v1999_v5, %v5696_v57  ;;  %v2002_v25 = vadd.f32 %v2001_v18, %v5699_v28 }
 0x238   : > { %v2088_v3 = vpop.f32.mrf.mxu0  ;;  %v2006_v5 = vadd.f32 %v5715_v38, %v5696_v57 }
 0x239   : > { %v2168_v33 = vmax.f32 %v2085_v6, 0.0  ;;  %v2273_v55 = vpack.c.bf16 %v2167_v8, %v2161_v7  ;;  %v5721_v39 = vpop.f32.mrf.mxu1  ;;  %v2089_v2 = vadd.f32 %v2088_v3, %v1976_v21 }
 0x23a   : > { %v2090_v12 = vpop.f32.mrf.mxu0  ;;  %v2008_v18 = vadd.f32 %v5721_v39, %v5699_v28 }
 0x23b   : > { %v2274_v10 = vpack.c.bf16 %v2168_v33, %v2162_v34  ;;  %v2091_v15 = vadd.f32 %v2090_v12, %v1978_v47  ;;  %v2009_v16 = vpop.f32.mrf.mxu1  ;;  %v2173_v4 = vmax.f32 %v2089_v2, 0.0 }
 0x23c   : > { %v2092_v62 = vpop.f32.mrf.mxu0 }
 0x23d   : > { %v2093_v53 = vadd.f32 %v2092_v62, %v1980_v36  ;;  %2927 = vmatprep.mubr.bf16.mxu0 %v2274_v10  ;;  %v2011_v54 = vpop.f32.mrf.mxu1  ;;  %v2174_v29 = vmax.f32 %v2091_v15, 0.0 }
 0x23e   : > { %v2094_v56 = vpop.f32.mrf.mxu0  ;;  %2928 = vmatmul.mubr.bf16.vlgmr.msra.gmra.mxu0 %v2273_v55  ;;  %v2010_v55 = vadd.f32 %v2009_v16, %v5696_v57 }
 0x23f   : > { %v2095_v13 = vadd.f32 %v2094_v56, %v1982_v24  ;;  %v2179_v61 = vmax.f32 %v2093_v53, 0.0  ;;  %v5727_v58 = vpop.f32.mrf.mxu1  ;;  %v2012_v53 = vadd.f32 %v2011_v54, %v5699_v28 }
 0x240   : > { %v2098_v27 = vpop.f32.mrf.mxu0  ;;  %v2016_v16 = vadd.f32 %v5727_v58, %v5696_v57 }
 0x241   : > { %v2180_v19 = vmax.f32 %v2095_v13, 0.0  ;;  %v2279_v43 = vpack.c.bf16 %v2179_v61, %v2173_v4  ;;  %v2017_v44 = vpop.f32.mrf.mxu1  ;;  %v2099_v14 = vadd.f32 %v2098_v27, %v1986_v50 }
 0x242   : > { %v2100_v46 = vpop.f32.mrf.mxu0  ;;  %v2018_v54 = vadd.f32 %v2017_v44, %v5699_v28 }
 0x243   : > { %v2280_v51 = vpack.c.bf16 %v2180_v19, %v2174_v29  ;;  %v2101_v0 = vadd.f32 %v2100_v46, %v1988_v17  ;;  %v2019_v31 = vpop.f32.mrf.mxu1  ;;  %v2185_v20 = vmax.f32 %v2099_v14, 0.0 }
 0x244   : > { %v2102_v22 = vpop.f32.mrf.mxu0 }
 0x245   : > { %v2103_v45 = vadd.f32 %v2102_v22, %v1990_v49  ;;  %2935 = vmatprep.mubr.bf16.mxu0 %v2280_v51  ;;  %v2186_v41 = vmax.f32 %v2101_v0, 0.0  ;;  %v2021_v26 = vpop.f32.mrf.mxu1  ;;  %v2020_v49 = vadd.f32 %v2019_v31, %v5696_v57 }
 0x246   : > { %v2104_v42 = vpop.f32.mrf.mxu0  ;;  %2936 = vmatmul.mubr.bf16.gmra.mxu0 %v2279_v43 }
 0x247   : > { %v2105_v32 = vadd.f32 %v2104_v42, %v1992_v48  ;;  %v2191_v1 = vmax.f32 %v2103_v45, 0.0  ;;  %v2025_v33 = vpop.f32.mrf.mxu1  ;;  %v2022_v48 = vadd.f32 %v2021_v26, %v5699_v28 }
 0x248   : > { %v2108_v9 = vpop.f32.mrf.mxu0  ;;  %v2026_v31 = vadd.f32 %v2025_v33, %v5696_v57 }
 0x249   : > { %v2192_v35 = vmax.f32 %v2105_v32, 0.0  ;;  %v2285_v11 = vpack.c.bf16 %v2191_v1, %v2185_v20  ;;  %v2109_v3 = vadd.f32 %v2108_v9, %v1996_v30  ;;  %v2027_v10 = vpop.f32.mrf.mxu1 }
 0x24a   : > { %v2110_v52 = vpop.f32.mrf.mxu0 }
 0x24b   : > { %v2286_v59 = vpack.c.bf16 %v2192_v35, %v2186_v41  ;;  %v2111_v6 = vadd.f32 %v2110_v52, %v1998_v37  ;;  %v2197_v63 = vmax.f32 %v2109_v3, 0.0  ;;  %v2029_v27 = vpop.f32.mrf.mxu1  ;;  %v2028_v52 = vadd.f32 %v2027_v10, %v5699_v28 }
 0x24c   : > { %v2112_v60 = vpop.f32.mrf.mxu0  ;;  %v2030_v26 = vadd.f32 %v2029_v27, %v5696_v57 }
 0x24d   : > { %v2113_v8 = vadd.f32 %v2112_v60, %v2000_v23  ;;  %2943 = vmatprep.mubr.bf16.mxu1 %v2286_v59  ;;  %v2198_v12 = vmax.f32 %v2111_v6, 0.0  ;;  %v2031_v17 = vpop.f32.mrf.mxu1 }
 0x24e   : > { %v2114_v34 = vpop.f32.mrf.mxu0  ;;  %2944 = vmatmul.mubr.bf16.vlgmr.msra.gmra.mxu1 %v2285_v11  ;;  %v2032_v11 = vadd.f32 %v2031_v17, %v5699_v28 }
 0x24f   : > { %v2115_v40 = vadd.f32 %v2114_v34, %v2002_v25  ;;  %v2203_v7 = vmax.f32 %v2113_v8, 0.0  ;;  %v2035_v32 = vpop.f32.mrf.mxu1 }
 0x250   : > { %v2118_v21 = vpop.f32.mrf.mxu0 }
 0x251   : > { %v2204_v47 = vmax.f32 %v2115_v40, 0.0  ;;  %v2291_v24 = vpack.c.bf16 %v2203_v7, %v2197_v63  ;;  %v2119_v13 = vadd.f32 %v2118_v21, %v2006_v5  ;;  %v2037_v30 = vpop.f32.mrf.mxu1 }
 0x252   : > { %v2120_v36 = vpop.f32.mrf.mxu0 }
 0x253   : > { %v2292_v62 = vpack.c.bf16 %v2204_v47, %v2198_v12  ;;  %v2121_v2 = vadd.f32 %v2120_v36, %v2008_v18  ;;  %v2209_v39 = vmax.f32 %v2119_v13, 0.0  ;;  %v2039_v8 = vpop.f32.mrf.mxu1  ;;  %v2036_v47 = vadd.f32 %v2035_v32, %v5696_v57 }
 0x254   : > { %v2122_v15 = vpop.f32.mrf.mxu0  ;;  %v2038_v36 = vadd.f32 %v2037_v30, %v5699_v28  ;;  %v2040_v10 = vadd.f32 %v2039_v8, %v5696_v57 }
 0x255   : > { %v2123_v56 = vadd.f32 %v2122_v15, %v2010_v55  ;;  %2951 = vmatprep.mubr.bf16.mxu1 %v2292_v62  ;;  %v2210_v4 = vmax.f32 %v2121_v2, 0.0  ;;  %v2041_v63 = vpop.f32.mrf.mxu1 }
 0x256   : > { %v2124_v61 = vpop.f32.mrf.mxu0  ;;  %2952 = vmatmul.mubr.bf16.gmra.mxu1 %v2291_v24  ;;  %v2042_v24 = vadd.f32 %v2041_v63, %v5699_v28 }
 0x257   : > { %v2125_v38 = vadd.f32 %v2124_v61, %v2012_v53  ;;  %v2215_v29 = vmax.f32 %v2123_v56, 0.0 }
 0x258   : > { %v2128_v19 = vpop.f32.mrf.mxu0 }
 0x259   : > { %v2216_v50 = vmax.f32 %v2125_v38, 0.0  ;;  %v2297_v43 = vpack.c.bf16 %v2215_v29, %v2209_v39  ;;  %v2129_v14 = vadd.f32 %v2128_v19, %v2016_v16 }
 0x25a   : > { %v2130_v46 = vpop.f32.mrf.mxu0 }
 0x25b   : > { %v2298_v51 = vpack.c.bf16 %v2216_v50, %v2210_v4  ;;  %v2131_v0 = vadd.f32 %v2130_v46, %v2018_v54  ;;  %v2221_v44 = vmax.f32 %v2129_v14, 0.0 }
 0x25c   : > { %v2132_v22 = vpop.f32.mrf.mxu0 }
 0x25d   : > { %v2133_v45 = vadd.f32 %v2132_v22, %v2020_v49  ;;  %2959 = vmatprep.mubr.bf16.mxu1 %v2298_v51  ;;  %v2222_v41 = vmax.f32 %v2131_v0, 0.0 }
 0x25e   : > { %v2134_v42 = vpop.f32.mrf.mxu0  ;;  %2960 = vmatmul.mubr.bf16.gmra.mxu1 %v2297_v43 }
 0x25f   : > { %v2135_v1 = vadd.f32 %v2134_v42, %v2022_v48  ;;  %v2227_v58 = vmax.f32 %v2133_v45, 0.0 }
 0x260   : > { %v2138_v9 = vpop.f32.mrf.mxu0 }
 0x261   : > { %v2228_v35 = vmax.f32 %v2135_v1, 0.0  ;;  %v2303_v23 = vpack.c.bf16 %v2227_v58, %v2221_v44  ;;  %v2139_v6 = vadd.f32 %v2138_v9, %v2026_v31 }
 0x262   : > { %v2140_v20 = vpop.f32.mrf.mxu0 }
 0x263   : > { %v2304_v37 = vpack.c.bf16 %v2228_v35, %v2222_v41  ;;  %v2141_v60 = vadd.f32 %v2140_v20, %v2028_v52  ;;  %v2233_v12 = vmax.f32 %v2139_v6, 0.0 }
 0x264   : > { %v2142_v59 = vpop.f32.mrf.mxu0 }
 0x265   : > { %v2143_v25 = vadd.f32 %v2142_v59, %v2030_v26  ;;  %2967 = vmatprep.mubr.bf16.mxu1 %v2304_v37  ;;  %v2234_v7 = vmax.f32 %v2141_v60, 0.0 }
 0x266   : > { %v2144_v3 = vpop.f32.mrf.mxu0  ;;  %2968 = vmatmul.mubr.bf16.gmra.mxu1 %v2303_v23 }
 0x267   : > { %v2145_v34 = vadd.f32 %v2144_v3, %v2032_v11  ;;  %v2239_v33 = vmax.f32 %v2143_v25, 0.0 }
 0x268   : > { %v2148_v40 = vpop.f32.mrf.mxu0 }
 0x269   : > { %v2240_v21 = vmax.f32 %v2145_v34, 0.0  ;;  %v2309_v55 = vpack.c.bf16 %v2239_v33, %v2233_v12  ;;  %v2149_v2 = vadd.f32 %v2148_v40, %v2036_v47 }
 0x26a   : > { %v2150_v5 = vpop.f32.mrf.mxu0 }
 0x26b   : > { %v2310_v18 = vpack.c.bf16 %v2240_v21, %v2234_v7  ;;  %v2151_v15 = vadd.f32 %v2150_v5, %v2038_v36  ;;  %v2245_v29 = vmax.f32 %v2149_v2, 0.0 }
 0x26c   : > { %v2152_v62 = vpop.f32.mrf.mxu0 }
 0x26d   : > { %v2153_v53 = vadd.f32 %v2152_v62, %v2040_v10  ;;  %2975 = vmatprep.mubr.bf16.mxu1 %v2310_v18  ;;  %v2246_v27 = vmax.f32 %v2151_v15, 0.0 }
 0x26e   : > { %v2154_v56 = vpop.f32.mrf.mxu0  ;;  %2976 = vmatmul.mubr.bf16.gmra.mxu1 %v2309_v55 }
 0x26f   : > { %v2155_v13 = vadd.f32 %v2154_v56, %v2042_v24  ;;  %v2251_v61 = vmax.f32 %v2153_v53, 0.0 }
 0x271   : > { %v2252_v38 = vmax.f32 %v2155_v13, 0.0  ;;  %v2315_v4 = vpack.c.bf16 %v2251_v61, %v2245_v29 }
 0x273   : > { %v2316_v19 = vpack.c.bf16 %v2252_v38, %v2246_v27 }
 0x275   : > { %2983 = vmatprep.mubr.bf16.mxu1 %v2316_v19 }
 0x276   : > { %2984 = vmatmul.mubr.bf16.gmra.mxu1 %v2315_v4 }
 0x280   : > { %v3749_v57 = vpop.f32.mrf.mxu1 }
 0x282   : > { %v3750_v50 = vpop.f32.mrf.mxu1 }
 0x283   : > { %v3751_v19 = vadd.f32 %v3750_v50, %v3749_v57  ;;  %v2254_v57 = vld [vmem:[#allocation2] sm:$0xff] }
 0x284   : > { %v5758_v39 = vpop.f32.mrf.mxu1 }
 0x286   : > { %v5760_v28 = vpop.f32.mrf.mxu1 }
 0x288   : > { %v5762_v16 = vpop.f32.mrf.mxu1 }
 0x28a   : > { %v5764_v46 = vpop.f32.mrf.mxu1 }
 0x28c   : > { %v5766_v17 = vpop.f32.mrf.mxu1 }
 0x28e   : > { %v5768_v54 = vpop.f32.mrf.mxu1 }
 0x290   : > { %v5770_v49 = vpop.f32.mrf.mxu1 }
 0x292   : > { %v5772_v51 = vpop.f32.mrf.mxu1 }
 0x294   : > { %v5774_v43 = vpop.f32.mrf.mxu1 }
 0x296   : > { %v5776_v22 = vpop.f32.mrf.mxu1 }
 0x298   : > { %v5778_v0 = vpop.f32.mrf.mxu1 }
 0x29a   : > { %v5780_v42 = vpop.f32.mrf.mxu1 }
 0x29c   : > { %v5782_v58 = vpop.f32.mrf.mxu1 }
 0x29e   : > { %v5786_v35 = vpop.f32.mrf.mxu1 }
 0x2a0   : > { %v5792_v20 = vpop.f32.mrf.mxu1 }
 0x2a2   : > { %v5798_v26 = vpop.f32.mrf.mxu1 }
 0x2a4   : > { %v5804_v59 = vpop.f32.mrf.mxu1 }
 0x2a6   : > { %v5810_v25 = vpop.f32.mrf.mxu1 }
 0x2a8   : > { %v5816_v3 = vpop.f32.mrf.mxu1 }
 0x2aa   : > { %v5822_v40 = vpop.f32.mrf.mxu1 }
 0x2ac   : > { %v5828_v12 = vpop.f32.mrf.mxu1 }
 0x2ae   : > { %v5834_v5 = vpop.f32.mrf.mxu1 }
 0x2b0   : > { %v5840_v18 = vpop.f32.mrf.mxu1 }
 0x2b1   : > { %6069 = vst [vmem:[#allocation29_spill] sm:$0xff] %v5840_v18 }
 0x2b2   : > { %v5846_v24 = vpop.f32.mrf.mxu1 }
 0x2b3   : > { %6072 = vst [vmem:[#allocation32_spill] sm:$0xff] %v5846_v24 }
 0x2b4   : > { %v5852_v2 = vpop.f32.mrf.mxu1 }
 0x2b5   : > { %6075 = vst [vmem:[#allocation35_spill] sm:$0xff] %v5852_v2 }
 0x2b6   : > { %v5858_v61 = vpop.f32.mrf.mxu1 }
 0x2b7   : > { %6078 = vst [vmem:[#allocation38_spill] sm:$0xff] %v5858_v61 }
 0x2b8   : > { %v5862_v4 = vpop.f32.mrf.mxu1 }
 0x2be   : > { %v3813_v48 = vpop.f32.mrf.mxu0 }
 0x2c0   : > { %v3814_v45 = vpop.f32.mrf.mxu0 }
 0x2c1   : > { %v3815_v38 = vadd.f32 %v3814_v45, %v3813_v48 }
 0x2c2   : > { %v3816_v14 = vpop.f32.mrf.mxu0 }
 0x2c3   : > { %v2833_v24 = vadd.f32 %v3815_v38, %v3751_v19  ;;  %v3757_v38 = vadd.f32 %v5764_v46, %v5762_v16 }
 0x2c4   : > { %v3817_v32 = vpop.f32.mrf.mxu0 }
 0x2c6   : > { %v3819_v1 = vpop.f32.mrf.mxu0 }
 0x2c8   : > { %v3820_v9 = vpop.f32.mrf.mxu0 }
 0x2ca   : > { %v5784_v41 = vpop.f32.mrf.mxu0 }
 0x2cc   : > { %v5788_v44 = vpop.f32.mrf.mxu0 }
 0x2ce   : > { %v5790_v31 = vpop.f32.mrf.mxu0 }
 0x2d0   : > { %v5794_v30 = vpop.f32.mrf.mxu0 }
 0x2d2   : > { %v5796_v52 = vpop.f32.mrf.mxu0 }
 0x2d4   : > { %v5800_v37 = vpop.f32.mrf.mxu0 }
 0x2d6   : > { %v5802_v23 = vpop.f32.mrf.mxu0 }
 0x2d8   : > { %v5806_v11 = vpop.f32.mrf.mxu0 }
 0x2da   : > { %v5808_v60 = vpop.f32.mrf.mxu0 }
 0x2dc   : > { %v5812_v6 = vpop.f32.mrf.mxu0 }
 0x2de   : > { %v5814_v8 = vpop.f32.mrf.mxu0 }
 0x2e0   : > { %v5818_v34 = vpop.f32.mrf.mxu0 }
 0x2e2   : > { %v5820_v33 = vpop.f32.mrf.mxu0 }
 0x2e4   : > { %v5824_v7 = vpop.f32.mrf.mxu0 }
 0x2e6   : > { %v5826_v21 = vpop.f32.mrf.mxu0 }
 0x2e8   : > { %v5830_v47 = vpop.f32.mrf.mxu0 }
 0x2ea   : > { %v5832_v63 = vpop.f32.mrf.mxu0 }
 0x2ec   : > { %v5836_v36 = vpop.f32.mrf.mxu0 }
 0x2ee   : > { %v5838_v10 = vpop.f32.mrf.mxu0 }
 0x2ef   : > { %6068 = vst [vmem:[#allocation28_spill] sm:$0xff] %v5838_v10 }
 0x2f0   : > { %v5842_v55 = vpop.f32.mrf.mxu0 }
 0x2f1   : > { %6070 = vst [vmem:[#allocation30_spill] sm:$0xff] %v5842_v55 }
 0x2f2   : > { %v5844_v62 = vpop.f32.mrf.mxu0 }
 0x2f3   : > { %6071 = vst [vmem:[#allocation31_spill] sm:$0xff] %v5844_v62 }
 0x2f4   : > { %v5848_v15 = vpop.f32.mrf.mxu0 }
 0x2f5   : > { %6073 = vst [vmem:[#allocation33_spill] sm:$0xff] %v5848_v15  ;;  %v3818_v15 = vadd.f32 %v3817_v32, %v3816_v14 }
 0x2f6   : > { %v5850_v53 = vpop.f32.mrf.mxu0 }
 0x2f7   : > { %6074 = vst [vmem:[#allocation34_spill] sm:$0xff] %v5850_v53  ;;  %v2253_v53 = vld [vmem:[#allocation2 + $0x30] sm:$0xff] }
 0x2f8   : > { %v5854_v56 = vpop.f32.mrf.mxu0 }
 0x2f9   : > { %6076 = vst [vmem:[#allocation36_spill] sm:$0xff] %v5854_v56  ;;  %v3754_v56 = vadd.f32 %v5760_v28, %v5758_v39  ;;  %v3824_v39 = vadd.f32 %v5788_v44, %v5784_v41  ;;  %v3763_v44 = vadd.f32 %v5772_v51, %v5770_v49  ;;  %v3833_v49 = vadd.f32 %v5806_v11, %v5802_v23 }
 0x2fa   : > { %v5856_v13 = vpop.f32.mrf.mxu0  ;;  %v3772_v23 = vadd.f32 %v5786_v35, %v5782_v58  ;;  %v3842_v58 = vadd.f32 %v5824_v7, %v5820_v33  ;;  %v3781_v33 = vadd.f32 %v5822_v40, %v5816_v3  ;;  %v6081_v3 = vld [vmem:[#allocation30_spill] sm:$0xff] }
 0x2fb   : > { %6077 = vst [vmem:[#allocation37_spill] sm:$0xff] %v5856_v13  ;;  %v5866_v13 = vpop.f32.mrf.mxu1  ;;  %v2836_v10 = vadd.f32 %v3818_v15, %v3754_v56  ;;  %v2256_v56 = vld [vmem:[#allocation2 + $0x18] sm:$0xff] }
 0x2fc   : > { %v5860_v27 = vpop.f32.mrf.mxu0 }
 0x2fd   : > { %6079 = vst [vmem:[#allocation39_spill] sm:$0xff] %v5860_v27  ;;  %v3821_v27 = vadd.f32 %v3820_v9, %v3819_v1  ;;  %v5870_v32 = vpop.f32.mrf.mxu1  ;;  %v3760_v9 = vadd.f32 %v5768_v54, %v5766_v17  ;;  %v3830_v54 = vadd.f32 %v5800_v37, %v5796_v52  ;;  %v3769_v52 = vadd.f32 %v5780_v42, %v5778_v0 }
 0x2fe   : > { %v3877_v29 = vpop.f32.mrf.mxu0  ;;  %v3839_v0 = vadd.f32 %v5818_v34, %v5814_v8  ;;  %v3778_v8 = vadd.f32 %v5810_v25, %v5804_v59  ;;  %v3848_v59 = vadd.f32 %v5836_v36, %v5832_v63  ;;  %v6083_v63 = vld [vmem:[#allocation32_spill] sm:$0xff] }
 0x2ff   : > { %v5876_v15 = vpop.f32.mrf.mxu1  ;;  %v2844_v46 = vadd.f32 %v3824_v39, %v3760_v9 }
 0x300   : > { %v3878_v62 = vpop.f32.mrf.mxu0 }
 0x301   : > { %v3879_v18 = vadd.f32 %v3878_v62, %v3877_v29  ;;  %v2841_v29 = vadd.f32 %v3821_v27, %v3757_v38 }
 0x302   : > { %v3880_v55 = vpop.f32.mrf.mxu0 }
 0x303   : > { %v2930_v2 = vadd.f32 %v3879_v18, %v2833_v24  ;;  %v2255_v24 = vld [vmem:[#allocation2 + $0x58] sm:$0xff] }
 0x304   : > { %v3881_v61 = vpop.f32.mrf.mxu0 }
 0x305   : > { %v2992_v48 = vadd.f32 %v2930_v2, %v2253_v53  ;;  %v3882_v45 = vadd.f32 %v3881_v61, %v3880_v55 }
 0x306   : > { %v3883_v50 = vpop.f32.mrf.mxu0 }
 0x307   : > { %3008 = vst [vmem:[#allocation2 + $0x30] sm:$0xff] %v2992_v48  ;;  %v2933_v14 = vadd.f32 %v3882_v45, %v2836_v10  ;;  %v3827_v10 = vadd.f32 %v5794_v30, %v5790_v31  ;;  %v2257_v45 = vld [vmem:[#allocation2 + $0x50] sm:$0xff]  ;;  %v3766_v31 = vadd.f32 %v5776_v22, %v5774_v43  ;;  %v3836_v43 = vadd.f32 %v5812_v6, %v5808_v60 }
 0x308   : > { %v3884_v62 = vpop.f32.mrf.mxu0  ;;  %v3775_v60 = vadd.f32 %v5798_v26, %v5792_v20  ;;  %v3845_v20 = vadd.f32 %v5830_v47, %v5826_v21  ;;  %v3784_v21 = vadd.f32 %v5834_v5, %v5828_v12  ;;  %v6085_v12 = vld [vmem:[#allocation33_spill] sm:$0xff] }
 0x309   : > { %v2993_v28 = vadd.f32 %v2933_v14, %v2254_v57  ;;  %v3885_v18 = vadd.f32 %v3884_v62, %v3883_v50  ;;  %v2849_v17 = vadd.f32 %v3827_v10, %v3763_v44  ;;  %v2852_v38 = vadd.f32 %v3830_v54, %v3766_v31  ;;  %v2258_v62 = vld [vmem:[#allocation2 + $0x68] sm:$0xff]  ;;  %v2262_v54 = vld [vmem:[#allocation2 + $0x20] sm:$0xff]  ;;  %v2263_v31 = vld [vmem:[#allocation2 + $0x10] sm:$0xff] }
 0x30a   : > { %v3886_v1 = vpop.f32.mrf.mxu0 }
 0x30b   : > { %3009 = vst [vmem:[#allocation2] sm:$0xff] %v2993_v28  ;;  %v2938_v55 = vadd.f32 %v3885_v18, %v2841_v29  ;;  %v2857_v28 = vadd.f32 %v3833_v49, %v3769_v52  ;;  %v6080_v49 = vld [vmem:[#allocation28_spill] sm:$0xff]  ;;  %v6082_v52 = vld [vmem:[#allocation29_spill] sm:$0xff] }
 0x30c   : > { %v3887_v16 = vpop.f32.mrf.mxu0  ;;  %v3851_v40 = vadd.f32 %v6081_v3, %v6080_v49  ;;  %v3787_v36 = vadd.f32 %v6083_v63, %v6082_v52 }
 0x30d   : > { %v2994_v53 = vadd.f32 %v2938_v55, %v2255_v24  ;;  %v3888_v2 = vadd.f32 %v3887_v16, %v3886_v1  ;;  %v2259_v24 = vld [vmem:[#allocation2 + $0x8] sm:$0xff]  ;;  %v2860_v55 = vadd.f32 %v3836_v43, %v3772_v23 }
 0x30e   : > { %v3889_v41 = vpop.f32.mrf.mxu1  ;;  %v6084_v43 = vld [vmem:[#allocation31_spill] sm:$0xff] }
 0x30f   : > { %3010 = vst [vmem:[#allocation2 + $0x58] sm:$0xff] %v2994_v53  ;;  %v2941_v61 = vadd.f32 %v3888_v2, %v2844_v46  ;;  %v2260_v46 = vld [vmem:[#allocation2 + $0x48] sm:$0xff]  ;;  %v2865_v2 = vadd.f32 %v3839_v0, %v3775_v60  ;;  %v3854_v5 = vadd.f32 %v6085_v12, %v6084_v43 }
 0x310   : > { %v3890_v27 = vpop.f32.mrf.mxu1  ;;  %v6086_v23 = vld [vmem:[#allocation35_spill] sm:$0xff] }
 0x311   : > { %v2995_v19 = vadd.f32 %v2941_v61, %v2256_v56  ;;  %v3891_v48 = vadd.f32 %v3890_v27, %v3889_v41  ;;  %v2261_v41 = vld [vmem:[#allocation2 + $0x40] sm:$0xff]  ;;  %v2868_v27 = vadd.f32 %v3842_v58, %v3778_v8  ;;  %v3793_v58 = vadd.f32 %v5866_v13, %v5862_v4  ;;  %v2268_v4 = vld [vmem:[#allocation2 + $0x28] sm:$0xff] }
 0x312   : > { %v3892_v57 = vpop.f32.mrf.mxu1  ;;  %v6091_v8 = vld [vmem:[#allocation39_spill] sm:$0xff] }
 0x313   : > { %3011 = vst [vmem:[#allocation2 + $0x18] sm:$0xff] %v2995_v19  ;;  %v2946_v30 = vadd.f32 %v3891_v48, %v2849_v17 }
 0x314   : > { %v3893_v50 = vpop.f32.mrf.mxu1 }
 0x315   : > { %v2996_v51 = vadd.f32 %v2946_v30, %v2257_v45  ;;  %v3894_v14 = vadd.f32 %v3893_v50, %v3892_v57  ;;  %v2873_v45 = vadd.f32 %v3845_v20, %v3781_v33  ;;  %v2267_v20 = vld [vmem:[#allocation2 + $0x78] sm:$0xff] }
 0x316   : > { %v3895_v29 = vpop.f32.mrf.mxu1 }
 0x317   : > { %3012 = vst [vmem:[#allocation2 + $0x50] sm:$0xff] %v2996_v51  ;;  %v2949_v37 = vadd.f32 %v3894_v14, %v2852_v38  ;;  %v2876_v38 = vadd.f32 %v3848_v59, %v3784_v21 }
 0x318   : > { %v3896_v39 = vpop.f32.mrf.mxu1 }
 0x319   : > { %v2997_v22 = vadd.f32 %v2949_v37, %v2258_v62  ;;  %v3897_v18 = vadd.f32 %v3896_v39, %v3895_v29  ;;  %v2264_v62 = vld [vmem:[#allocation2 + $0x38] sm:$0xff] }
 0x31a   : > { %v3898_v1 = vpop.f32.mrf.mxu1 }
 0x31b   : > { %3013 = vst [vmem:[#allocation2 + $0x68] sm:$0xff] %v2997_v22  ;;  %v2954_v11 = vadd.f32 %v3897_v18, %v2857_v28  ;;  %v2881_v28 = vadd.f32 %v3851_v40, %v3787_v36 }
 0x31c   : > { %v3899_v9 = vpop.f32.mrf.mxu1 }
 0x31d   : > { %v2998_v42 = vadd.f32 %v2954_v11, %v2259_v24  ;;  %v3900_v16 = vadd.f32 %v3899_v9, %v3898_v1  ;;  %v2265_v24 = vld [vmem:[#allocation2 + $0x60] sm:$0xff] }
 0x31e   : > { %v3901_v10 = vpop.f32.mrf.mxu1  ;;  %v6087_v11 = vld [vmem:[#allocation38_spill] sm:$0xff] }
 0x31f   : > { %3014 = vst [vmem:[#allocation2 + $0x8] sm:$0xff] %v2998_v42  ;;  %v2957_v6 = vadd.f32 %v3900_v16, %v2860_v55  ;;  %v3790_v9 = vadd.f32 %v6087_v11, %v6086_v23  ;;  %v6088_v16 = vld [vmem:[#allocation34_spill] sm:$0xff] }
 0x320   : > { %v3902_v53 = vpop.f32.mrf.mxu1 }
 0x321   : > { %v2999_v35 = vadd.f32 %v2957_v6, %v2260_v46  ;;  %v3903_v56 = vadd.f32 %v3902_v53, %v3901_v10  ;;  %v2884_v42 = vadd.f32 %v3854_v5, %v3790_v9  ;;  %v6089_v46 = vld [vmem:[#allocation36_spill] sm:$0xff] }
 0x322   : > { %v3904_v44 = vpop.f32.mrf.mxu1  ;;  %v3857_v10 = vadd.f32 %v6089_v46, %v6088_v16  ;;  %v2266_v53 = vld [vmem:[#allocation2 + $0x70] sm:$0xff] }
 0x323   : > { %3015 = vst [vmem:[#allocation2 + $0x48] sm:$0xff] %v2999_v35  ;;  %v2962_v34 = vadd.f32 %v3903_v56, %v2865_v2 }
 0x324   : > { %v3905_v61 = vpop.f32.mrf.mxu1 }
 0x325   : > { %v3000_v26 = vadd.f32 %v2962_v34, %v2261_v41  ;;  %v3906_v17 = vadd.f32 %v3905_v61, %v3904_v44  ;;  %v2889_v41 = vadd.f32 %v3857_v10, %v3793_v58  ;;  %v6090_v44 = vld [vmem:[#allocation37_spill] sm:$0xff] }
 0x326   : > { %v3907_v19 = vpop.f32.mrf.mxu1  ;;  %v3860_v34 = vadd.f32 %v6091_v8, %v6090_v44 }
 0x327   : > { %3016 = vst [vmem:[#allocation2 + $0x40] sm:$0xff] %v3000_v26  ;;  %v2965_v7 = vadd.f32 %v3906_v17, %v2868_v27  ;;  %v3796_v17 = vadd.f32 %v5876_v15, %v5870_v32 }
 0x328   : > { %v3908_v48 = vpop.f32.mrf.mxu1 }
 0x329   : > { %v3001_v25 = vadd.f32 %v2965_v7, %v2262_v54  ;;  %v3909_v57 = vadd.f32 %v3908_v48, %v3907_v19  ;;  %v2892_v33 = vadd.f32 %v3860_v34, %v3796_v17 }
 0x32a   : > { %v3910_v30 = vpop.f32.mrf.mxu1 }
 0x32b   : > { %3017 = vst [vmem:[#allocation2 + $0x20] sm:$0xff] %v3001_v25  ;;  %v2970_v47 = vadd.f32 %v3909_v57, %v2873_v45 }
 0x32c   : > { %v3911_v50 = vpop.f32.mrf.mxu1 }
 0x32d   : > { %v3002_v51 = vadd.f32 %v2970_v47, %v2263_v31  ;;  %v3912_v14 = vadd.f32 %v3911_v50, %v3910_v30 }
 0x32e   : > { %v3913_v29 = vpop.f32.mrf.mxu1 }
 0x32f   : > { %3018 = vst [vmem:[#allocation2 + $0x10] sm:$0xff] %v3002_v51  ;;  %v2973_v37 = vadd.f32 %v3912_v14, %v2876_v38 }
 0x330   : > { %v3914_v39 = vpop.f32.mrf.mxu1 }
 0x331   : > { %v3003_v22 = vadd.f32 %v2973_v37, %v2264_v62  ;;  %v3915_v18 = vadd.f32 %v3914_v39, %v3913_v29 }
 0x332   : > { %v3916_v1 = vpop.f32.mrf.mxu1 }
 0x333   : > { %3019 = vst [vmem:[#allocation2 + $0x38] sm:$0xff] %v3003_v22  ;;  %v2978_v55 = vadd.f32 %v3915_v18, %v2881_v28 }
 0x334   : > { %v3917_v0 = vpop.f32.mrf.mxu1 }
 0x335   : > { %v3004_v60 = vadd.f32 %v2978_v55, %v2265_v24  ;;  %v3918_v6 = vadd.f32 %v3917_v0, %v3916_v1 }
 0x336   : > { %v3919_v2 = vpop.f32.mrf.mxu1 }
 0x337   : > { %3020 = vst [vmem:[#allocation2 + $0x60] sm:$0xff] %v3004_v60  ;;  %v2981_v35 = vadd.f32 %v3918_v6, %v2884_v42 }
 0x338   : > { %v3920_v56 = vpop.f32.mrf.mxu1 }
 0x339   : > { %v3005_v61 = vadd.f32 %v2981_v35, %v2266_v53  ;;  %v3921_v27 = vadd.f32 %v3920_v56, %v3919_v2 }
 0x33a   : > { %v3922_v26 = vpop.f32.mrf.mxu1 }
 0x33b   : > { %3021 = vst [vmem:[#allocation2 + $0x70] sm:$0xff] %v3005_v61  ;;  %v2986_v54 = vadd.f32 %v3921_v27, %v2889_v41 }
 0x33c   : > { %v3923_v19 = vpop.f32.mrf.mxu1 }
 0x33d   : > { %v3006_v7 = vadd.f32 %v2986_v54, %v2267_v20  ;;  %v3924_v13 = vadd.f32 %v3923_v19, %v3922_v26 }
 0x33f   : > { %3022 = vst [vmem:[#allocation2 + $0x78] sm:$0xff] %v3006_v7  ;;  %v2989_v48 = vadd.f32 %v3924_v13, %v2892_v33  ;;  %3027 = sbr.rel (%p3646_p13) target bundleno = 848 (0x350), region = 64 }
 0x341   : > { %v3007_v45 = vadd.f32 %v2989_v48, %v2268_v4 }
 0x343   : > { %3023 = vst [vmem:[#allocation2 + $0x28] sm:$0xff] %v3007_v45 }
 0x344   : > { %v3028_v59 = vld [vmem:[#allocation2 + $0x30] sm:$0xff]  ;;  %v3029_v25 = vld [vmem:[#allocation2] sm:$0xff]  ;;  %v3030_v31 = vld [vmem:[#allocation2 + $0x58] sm:$0xff] }
 0x345   : > { %v3647_v57 = vld [vmem:[%s345_s28] ss:$0 sm:$0xff]  ;;  %v3031_v30 = vld [vmem:[#allocation2 + $0x18] sm:$0xff]  ;;  %v3032_v21 = vld [vmem:[#allocation2 + $0x50] sm:$0xff] }
 0x346   : > { %v3051_v32 = vadd.f32 %v3647_v57, %v3028_v59  ;;  %v3052_v15 = vadd.f32 %v3647_v57, %v3029_v25  ;;  %v3053_v47 = vadd.f32 %v3647_v57, %v3030_v31  ;;  %v3054_v50 = vadd.f32 %v3647_v57, %v3031_v30  ;;  %v3033_v38 = vld [vmem:[#allocation2 + $0x68] sm:$0xff]  ;;  %v3036_v52 = vld [vmem:[#allocation2 + $0x40] sm:$0xff]  ;;  %v3038_v36 = vld [vmem:[#allocation2 + $0x10] sm:$0xff] }
 0x347   : > { %v3055_v49 = vadd.f32 %v3647_v57, %v3032_v21  ;;  %v3034_v3 = vld [vmem:[#allocation2 + $0x8] sm:$0xff]  ;;  %v3056_v14 = vadd.f32 %v3647_v57, %v3033_v38  ;;  %v3037_v63 = vld [vmem:[#allocation2 + $0x20] sm:$0xff]  ;;  %v3059_v39 = vadd.f32 %v3647_v57, %v3036_v52  ;;  %v3039_v43 = vld [vmem:[#allocation2 + $0x38] sm:$0xff]  ;;  %v3061_v12 = vadd.f32 %v3647_v57, %v3038_v36 }
 0x348   : > { %v3035_v40 = vld [vmem:[#allocation2 + $0x48] sm:$0xff]  ;;  %v3689_v51 = vpack.c.bf16 %v3052_v15, %v3051_v32  ;;  %v3057_v62 = vadd.f32 %v3647_v57, %v3034_v3  ;;  %v3694_v37 = vpack.c.bf16 %v3054_v50, %v3053_v47  ;;  %v3060_v28 = vadd.f32 %v3647_v57, %v3037_v63  ;;  %v3040_v5 = vld [vmem:[#allocation2 + $0x60] sm:$0xff]  ;;  %v3041_v22 = vld [vmem:[#allocation2 + $0x70] sm:$0xff] }
 0x349   : > { %v3058_v29 = vadd.f32 %v3647_v57, %v3035_v40  ;;  %v3699_v18 = vpack.c.bf16 %v3056_v14, %v3055_v49  ;;  %v3062_v1 = vadd.f32 %v3647_v57, %v3039_v43  ;;  %v3063_v23 = vadd.f32 %v3647_v57, %v3040_v5  ;;  %v3042_v11 = vld [vmem:[#allocation2 + $0x78] sm:$0xff] }
 0x34a   : > { %3690 = vst [vmem:[%s4941_s8] sm:$0xff] %v3689_v51   ;;  %v3043_v9 = vld [vmem:[#allocation2 + $0x28] sm:$0xff]  ;;  %3726 = vst [vmem:[%s4941_s8 + $0x8] sm:$0xff] %v3694_v37   ;;  %v3709_v55 = vpack.c.bf16 %v3060_v28, %v3059_v39  ;;  %v3064_v0 = vadd.f32 %v3647_v57, %v3041_v22  ;;  %v3065_v42 = vadd.f32 %v3647_v57, %v3042_v11 }
 0x34b   : > { %v3704_v24 = vpack.c.bf16 %v3058_v29, %v3057_v62  ;;  %v3066_v16 = vadd.f32 %v3647_v57, %v3043_v9  ;;  %3727 = vst [vmem:[%s4941_s8 + $0x10] sm:$0xff] %v3699_v18   ;;  %v3714_v46 = vpack.c.bf16 %v3062_v1, %v3061_v12 }
 0x34c   : > { %3729 = vst [vmem:[%s4941_s8 + $0x20] sm:$0xff] %v3709_v55   ;;  %v3719_v10 = vpack.c.bf16 %v3064_v0, %v3063_v23 }
 0x34d   : > { %3728 = vst [vmem:[%s4941_s8 + $0x18] sm:$0xff] %v3704_v24   ;;  %v3724_v60 = vpack.c.bf16 %v3066_v16, %v3065_v42  ;;  %3730 = vst [vmem:[%s4941_s8 + $0x28] sm:$0xff] %v3714_v46  }
 0x34e   : > { %3731 = vst [vmem:[%s4941_s8 + $0x30] sm:$0xff] %v3719_v10  }
 0x34f   : > { %3732 = vst [vmem:[%s4941_s8 + $0x38] sm:$0xff] %v3724_v60  }
 0x350 PF: > { %p6093_p9 = scmp.ne.s32.totalorder %s6057_s26, 0 }
 0x351   : > { %s6094_s11 = sld [smem:[#allocation20_spill]] (%p6093_p9)  ;;  %v3175_v6 = vld [vmem:[%s4941_s8] sm:$0xf] (%p6093_p9)  ;;  %v3177_v53 = vld [vmem:[%s4941_s8 + $0x4] sm:$0xf] (%p6093_p9) }
 0x352   : > { %3153 = sbr.rel (!%p6093_p9) target bundleno = 865 (0x361), region = 68  ;;  %s6095_s10 = sld [smem:[#allocation43_spill]] (%p6093_p9)  ;;  %v3179_v2 = vld [vmem:[%s4941_s8 + $0x8] sm:$0xf] (%p6093_p9)  ;;  %v3181_v58 = vld [vmem:[%s4941_s8 + $0xc] sm:$0xf] (%p6093_p9) }
 0x353   : > { %v3183_v35 = vld [vmem:[%s4941_s8 + $0x10] sm:$0xf] (%p6093_p9)  ;;  %v3185_v56 = vld [vmem:[%s4941_s8 + $0x14] sm:$0xf] (%p6093_p9)  ;;  %v3191_v8 = vld [vmem:[%s4941_s8 + $0x20] sm:$0xf] (%p6093_p9) }
 0x354   : > { %v3187_v41 = vld [vmem:[%s4941_s8 + $0x18] sm:$0xf] (%p6093_p9)  ;;  %v3189_v44 = vld [vmem:[%s4941_s8 + $0x1c] sm:$0xf] (%p6093_p9)  ;;  %v3193_v34 = vld [vmem:[%s4941_s8 + $0x24] sm:$0xf] (%p6093_p9) }
 0x355   : > { %v3195_v61 = vld [vmem:[%s4941_s8 + $0x28] sm:$0xf] (%p6093_p9)  ;;  %v3197_v27 = vld [vmem:[%s4941_s8 + $0x2c] sm:$0xf] (%p6093_p9)  ;;  %v3199_v20 = vld [vmem:[%s4941_s8 + $0x30] sm:$0xf] (%p6093_p9) }
 0x356   : > { %v3201_v26 = vld [vmem:[%s4941_s8 + $0x34] sm:$0xf] (%p6093_p9)  ;;  %v3203_v17 = vld [vmem:[%s4941_s8 + $0x38] sm:$0xf] (%p6093_p9)  ;;  %v3205_v54 = vld [vmem:[%s4941_s8 + $0x3c] sm:$0xf] (%p6093_p9) }
 0x357   : > { %s3665_s7 = sshll.u32 %s6094_s11, 2 }
 0x358   : > { %s3158_s21 = scalar_lea.vmem %s6095_s10, %s3665_s7 }
 0x359   : > { %3176 = vst [vmem:[%s3158_s21] sm:$0xf] %v3175_v6  ;;  %3178 = vst [vmem:[%s3158_s21 + $0xc] sm:$0xf] %v3177_v53 }
 0x35a   : > { %3180 = vst [vmem:[%s3158_s21 + $0x18] sm:$0xf] %v3179_v2  ;;  %3182 = vst [vmem:[%s3158_s21 + $0x24] sm:$0xf] %v3181_v58 }
 0x35b   : > { %3184 = vst [vmem:[%s3158_s21 + $0x30] sm:$0xf] %v3183_v35  ;;  %3186 = vst [vmem:[%s3158_s21 + $0x3c] sm:$0xf] %v3185_v56 }
 0x35c   : > { %3188 = vst [vmem:[%s3158_s21 + $0x48] sm:$0xf] %v3187_v41  ;;  %3190 = vst [vmem:[%s3158_s21 + $0x54] sm:$0xf] %v3189_v44 }
 0x35d   : > { %3192 = vst [vmem:[%s3158_s21 + $0x60] sm:$0xf] %v3191_v8  ;;  %3194 = vst [vmem:[%s3158_s21 + $0x6c] sm:$0xf] %v3193_v34 }
 0x35e   : > { %3196 = vst [vmem:[%s3158_s21 + $0x78] sm:$0xf] %v3195_v61  ;;  %3198 = vst [vmem:[%s3158_s21 + $0x84] sm:$0xf] %v3197_v27 }
 0x35f   : > { %3200 = vst [vmem:[%s3158_s21 + $0x90] sm:$0xf] %v3199_v20  ;;  %3202 = vst [vmem:[%s3158_s21 + $0x9c] sm:$0xf] %v3201_v26 }
 0x360   : > { %3204 = vst [vmem:[%s3158_s21 + $0xa8] sm:$0xf] %v3203_v17  ;;  %3206 = vst [vmem:[%s3158_s21 + $0xb4] sm:$0xf] %v3205_v54 }
 0x361 PF: > { %s24_s6 = sadd.s32 1, %s4629_s6   ;;  %s6097_s21 = sld [smem:[#allocation15_spill]] }
 0x362   : > { %p5960_p1 = scmp.ge.s32.totalorder %s24_s6, 8   ;;  %s6098_s22 = sld [smem:[#allocation16_spill]] }
 0x363   : > { %s6099_s23 = sld [smem:[#allocation25_spill]]  ;;  %s6106_s18 = smov %s4581_s19 }
 0x364   : > { %s6100_s24 = sld [smem:[#allocation17_spill]]  ;;  %s6107_s19 = smov %s4585_s20 }
 0x365   : > { %s6101_s25 = sld [smem:[#allocation18_spill]]  ;;  %s6108_s20 = smov %s4878_s27 }
 0x366   : > { %s6102_s12 = sld [smem:[#allocation23_spill]]  ;;  %s6110_s27 = smov %s4621_s29 }
 0x367   : > { %s6103_s8 = sld [smem:[#allocation21_spill]]  ;;  %s6111_s28 = smov %s4625_s30 }
 0x368   : > { %s6104_s5 = sld [smem:[#allocation22_spill]] }
 0x36a   :  { %23 = sbr.rel (!%p5960_p1) target bundleno = 17 (0x11), region = 169 }
 0x36c   : > { %s6109_s26 = smov %s6102_s12 }
 0x36d   : > { %s6112_s29 = smov %s6103_s8 }
 0x36e   : > { %s6113_s30 = smov %s6104_s5 }
 0x36f   :  { %3272 = vsyncpa [#allocation4], 1 }
 0x370   :  { %3274 = vsyncpa [#allocation4 + $0x1], 1 }
 0x371   :  { %3275 = vsyncpa [#allocation6], 1 }
 0x372   :  { %3277 = vsyncpa [#allocation6 + $0x1], 1 }
 0x373   :  { %3278 = vsyncpa [#allocation9], 1 }
 0x374   :  { %3280 = vsyncpa [#allocation9 + $0x1], 1 }

</bundles_post_ra>
